<compile_context>
chip_gen: v7x
topology: tpu7x:2x2x1
jax: 0.10.0
libtpu: 0.0.40
codegen_flags: <defaults>
</compile_context>

<pallas_src>
import jax
import jax.numpy as jnp
from jax.experimental import pallas as pl
from jax.experimental.pallas import tpu as pltpu

LANE = 128     # lane width: hidden/output feature dims padded to multiples
SUBLANE = 8    # sublane width: batch tile must be a multiple of this


def _round_up(n, m):
    return ((n + m - 1) // m) * m


def _cdiv(a, b):
    return -(-a // b)


def _leaky_relu(v, slope=0.2):
    return jnp.where(v > 0, v, slope * v)


def _vmem_capacity_bytes():
    """Physical VMEM per TensorCore; conservative 64 MiB (v7x) if unknown."""
    try:
        info = pltpu.get_tpu_info()
        cap = getattr(info, "vmem_capacity_bytes", None)
        if cap:
            return int(cap)
    except Exception:
        pass
    return 64 * 2**20


# ----------------------------------------------------------------------------
# Kernel: five fused dense layers (fc1 split over z/y, fc2, 3 mid-tap "convs").
# ----------------------------------------------------------------------------
def decoder_kernel(z_ref, y_ref,
                   w1z_ref, w1y_ref, b1_ref,
                   w2_ref, b2_ref,
                   wc1_ref, bc1_ref,
                   wc2_ref, bc2_ref,
                   wc3_ref, bc3_ref,
                   out_ref):
    def dense(h, w_ref, b_ref):
        # Cast activations to the weight dtype (bf16 -> native MXU; no-op for
        # f32); accumulate in f32; bias / activation math stays f32 on the VPU.
        return jnp.dot(h.astype(w_ref.dtype), w_ref[...],
                       preferred_element_type=jnp.float32) + b_ref[...]

    # fc1: fused concat-free first layer  (z @ w1_z + y @ w1_y + b1)
    h = (jnp.dot(z_ref[...].astype(w1z_ref.dtype), w1z_ref[...],
                 preferred_element_type=jnp.float32)
         + jnp.dot(y_ref[...].astype(w1y_ref.dtype), w1y_ref[...],
                   preferred_element_type=jnp.float32)
         + b1_ref[...])
    h = _leaky_relu(h)
    h = _leaky_relu(dense(h, w2_ref, b2_ref))      # fc2   + LeakyReLU(0.2)
    h = _leaky_relu(dense(h, wc1_ref, bc1_ref))    # convT1 (mid tap) + LeakyReLU
    h = _leaky_relu(dense(h, wc2_ref, bc2_ref))    # convT2 (mid tap) + LeakyReLU
    h = dense(h, wc3_ref, bc3_ref)                 # convT3 (mid tap)
    out_ref[...] = jnp.maximum(h, 0.0).astype(out_ref.dtype)   # final ReLU


# ----------------------------------------------------------------------------
# One-time parameter preparation (hoisted out of the per-call path).
# ----------------------------------------------------------------------------
def _pad2d(w, rows, cols, dtype):
    return (jnp.zeros((rows, cols), jnp.float32)
            .at[: w.shape[0], : w.shape[1]].set(w.astype(jnp.float32))
            .astype(dtype))


def _pad_bias(b, cols):
    return jnp.zeros((1, cols), jnp.float32).at[0, : b.shape[0]].set(
        b.astype(jnp.float32))


def prepare_params(params, latent_dim, weight_dtype=jnp.bfloat16):
    """Slice ConvT middle taps, split fc1 over (z, y), reshape biases, zero-pad
    hidden/output dims to lane multiples, cast weights.  Call once."""
    (w1, b1, w2, b2, wc1, bc1, wc2, bc2, wc3, bc3) = params
    in_dim, hidden = w1.shape
    signal_dim = in_dim - latent_dim
    num_channels = wc3.shape[1]

    # Only the middle tap contributes for L=1, k=3, s=1, p=1.
    wc1_m, wc2_m, wc3_m = wc1[:, :, 1], wc2[:, :, 1], wc3[:, :, 1]

    ph = _round_up(hidden, LANE)
    pout = _round_up(num_channels, LANE)

    # fc1 split: first latent_dim rows act on z, the rest on y (concat-free).
    w1z, w1y = w1[:latent_dim], w1[latent_dim:]

    weights = (
        _pad2d(w1z, latent_dim, ph, weight_dtype),
        _pad2d(w1y, signal_dim, ph, weight_dtype),
        _pad2d(w2, ph, ph, weight_dtype),
        _pad2d(wc1_m, ph, ph, weight_dtype),
        _pad2d(wc2_m, ph, ph, weight_dtype),
        _pad2d(wc3_m, ph, pout, weight_dtype),
    )
    biases = (_pad_bias(b1, ph), _pad_bias(b2, ph), _pad_bias(bc1, ph),
              _pad_bias(bc2, ph), _pad_bias(bc3, pout))

    return dict(weights=weights, biases=biases,
                latent_dim=latent_dim, signal_dim=signal_dim,
                num_channels=num_channels,
                padded_hidden=ph, padded_out=pout)


# ----------------------------------------------------------------------------
# Forward pass.
# ----------------------------------------------------------------------------
def _pad_batch(a, pb, dtype):
    if a.shape[0] == pb and a.dtype == jnp.dtype(dtype):
        return a
    return jnp.zeros((pb, a.shape[1]), dtype).at[: a.shape[0]].set(
        a.astype(dtype))


def decoder_forward(z, y, prepared, *, batch_tile=512, io_dtype=None):
    """z: (B, latent_dim), y: (B, signal_dim) -> x_hat: (B, num_channels) f32."""
    B = z.shape[0]
    ld = prepared["latent_dim"]
    sd = prepared["signal_dim"]
    ph = prepared["padded_hidden"]
    pout = prepared["padded_out"]
    C = prepared["num_channels"]
    assert z.shape[1] == ld and y.shape[1] == sd

    w1z, w1y, w2, wc1, wc2, wc3 = prepared["weights"]
    b1, b2, bc1, bc2, bc3 = prepared["biases"]

    # Stream batch I/O in the weight precision (bf16 halves HBM traffic on the
    # only per-step DMAs); compute still accumulates in f32 inside the kernel.
    if io_dtype is None:
        io_dtype = jnp.bfloat16 if w2.dtype == jnp.dtype(jnp.bfloat16) else jnp.float32
    io_itemsize = jnp.dtype(io_dtype).itemsize

    # ---- generation-aware VMEM budget & batch-tile sizing ------------------
    cap = _vmem_capacity_bytes()          # 64 MiB on v7x, 128 MiB on v5e/v6e
    budget = int(0.75 * cap)              # ~48 MiB v7x, ~96 MiB v5e/v6e
    # Resident params: conservatively assume 2 buffers each (covers the
    # fallback path if single-buffering via pl.Buffered(1) is unavailable).
    resident = 2 * (sum(int(w.size) * w.dtype.itemsize for w in prepared["weights"])
                    + sum(int(b.size) * 4 for b in prepared["biases"]))
    per_row = (2 * (ld + sd) * io_itemsize     # double-buffered z / y tiles
               + 2 * pout * io_itemsize        # double-buffered out tile
               + 4 * max(ph, pout) * 4)        # f32 intermediates headroom

    pb0 = _round_up(B, SUBLANE)
    tm = min(_round_up(batch_tile, SUBLANE), pb0)
    if budget > resident:
        tm_fit = max(SUBLANE, ((budget - resident) // per_row) // SUBLANE * SUBLANE)
    else:
        tm_fit = SUBLANE
    tm = max(SUBLANE, min(tm, tm_fit))

    # Guarantee >=2 grid steps when the batch allows, so both v7x TCs get work.
    nsteps = _cdiv(pb0, tm)
    if nsteps == 1 and pb0 >= 2 * SUBLANE:
        nsteps = 2
    tm = _round_up(_cdiv(pb0, nsteps), SUBLANE)
    pb = tm * nsteps

    need = resident + tm * per_row
    vmem_limit = int(min(int(0.9 * cap), max(8 * 2**20, int(1.25 * need))))

    # ---- inputs (batch-dim pad only; feature dims of z/y stay unpadded) ----
    zp = _pad_batch(z, pb, io_dtype)
    yp = _pad_batch(y, pb, io_dtype)

    stream = lambda i: (i, 0)    # z / y / out tiles stream with the grid
    const = lambda i: (0, 0)     # weights / biases: resident across steps

    def run(single_buffer_weights):
        def wspec(shape):
            if single_buffer_weights:
                return pl.BlockSpec(shape, const, pipeline_mode=pl.Buffered(1))
            return pl.BlockSpec(shape, const)

        in_specs = [
            pl.BlockSpec((tm, ld), stream),          # z tile
            pl.BlockSpec((tm, sd), stream),          # y tile
            wspec((ld, ph)), wspec((sd, ph)), wspec((1, ph)),     # fc1
            wspec((ph, ph)), wspec((1, ph)),                      # fc2
            wspec((ph, ph)), wspec((1, ph)),                      # convT1
            wspec((ph, ph)), wspec((1, ph)),                      # convT2
            wspec((ph, pout)), wspec((1, pout)),                  # convT3
        ]
        out_spec = pl.BlockSpec((tm, pout), stream)

        return pl.pallas_call(
            decoder_kernel,
            out_shape=jax.ShapeDtypeStruct((pb, pout), io_dtype),
            grid=(pb // tm,),
            in_specs=in_specs,
            out_specs=out_spec,
            compiler_params=pltpu.CompilerParams(
                dimension_semantics=("parallel",),    # shard batch tiles on v7x
                vmem_limit_bytes=vmem_limit),
        )(zp, yp, w1z, w1y, b1, w2, b2, wc1, bc1, wc2, bc2, wc3, bc3)

    try:
        out_padded = run(True)        # single-buffered resident weights
    except Exception:
        out_padded = run(False)       # fallback: default double-buffering

    return out_padded[:B, :C].astype(jnp.float32)


# ----------------------------------------------------------------------------
# Synthetic parameters + pure-JAX reference.
# ----------------------------------------------------------------------------
def init_params(key, latent_dim, signal_dim, hidden_dim, num_channels,
                kernel_size=3):
    """Deterministic synthetic parameters matching the torch module's shapes."""
    ks = jax.random.split(key, 10)
    in_dim = latent_dim + signal_dim
    scale = 0.1
    # Linear weights stored pre-transposed as (in, out); torch is (out, in).
    w1 = scale * jax.random.normal(ks[0], (in_dim, hidden_dim), jnp.float32)
    b1 = scale * jax.random.normal(ks[1], (hidden_dim,), jnp.float32)
    w2 = scale * jax.random.normal(ks[2], (hidden_dim, hidden_dim), jnp.float32)
    b2 = scale * jax.random.normal(ks[3], (hidden_dim,), jnp.float32)
    # ConvTranspose1d weight shape: (in_channels, out_channels, kernel_size).
    wc1 = scale * jax.random.normal(ks[4], (hidden_dim, hidden_dim, kernel_size), jnp.float32)
    bc1 = scale * jax.random.normal(ks[5], (hidden_dim,), jnp.float32)
    wc2 = scale * jax.random.normal(ks[6], (hidden_dim, hidden_dim, kernel_size), jnp.float32)
    bc2 = scale * jax.random.normal(ks[7], (hidden_dim,), jnp.float32)
    wc3 = scale * jax.random.normal(ks[8], (hidden_dim, num_channels, kernel_size), jnp.float32)
    bc3 = scale * jax.random.normal(ks[9], (num_channels,), jnp.float32)
    return (w1, b1, w2, b2, wc1, bc1, wc2, bc2, wc3, bc3)


def decoder_reference(z, y, params):
    """Pure-JAX reference mirroring the torch forward semantics (L=1 conv-T)."""
    (w1, b1, w2, b2, wc1, bc1, wc2, bc2, wc3, bc3) = params
    x = jnp.concatenate([z, y], axis=1)
    h = jax.nn.leaky_relu(x @ w1 + b1, 0.2)
    h = jax.nn.leaky_relu(h @ w2 + b2, 0.2)
    h = jax.nn.leaky_relu(h @ wc1[:, :, 1] + bc1, 0.2)
    h = jax.nn.leaky_relu(h @ wc2[:, :, 1] + bc2, 0.2)
    return jax.nn.relu(h @ wc3[:, :, 1] + bc3)


if __name__ == "__main__":
    latent_dim = 8
    signal_dim = 8
    hidden_dim = 32
    num_channels = 1
    batch = 2

    key = jax.random.PRNGKey(0)
    kz, ky, kp = jax.random.split(key, 3)
    z = jax.random.normal(kz, (batch, latent_dim), jnp.float32)
    y = jax.random.normal(ky, (batch, signal_dim), jnp.float32)
    params = init_params(kp, latent_dim, signal_dim, hidden_dim, num_channels)

    ref = decoder_reference(z, y, params)

    # 1) f32 path: exact check against the reference.
    prepared_f32 = prepare_params(params, latent_dim, weight_dtype=jnp.float32)
    x_hat_f32 = jax.block_until_ready(decoder_forward(z, y, prepared_f32))
    assert x_hat_f32.shape == (batch, num_channels)
    assert jnp.allclose(x_hat_f32, ref, atol=1e-5, rtol=1e-5)

    # 2) default bf16 path: bf16 weights + bf16 streaming I/O, f32 accumulation.
    prepared_bf16 = prepare_params(params, latent_dim)   # bf16 by default
    x_hat_bf16 = jax.block_until_ready(decoder_forward(z, y, prepared_bf16))
    assert x_hat_bf16.shape == (batch, num_channels)
    assert jnp.allclose(x_hat_bf16, ref, atol=5e-2, rtol=5e-2)

    print("KERNEL_OK")
</pallas_src>

<mosaic_0001>
module attributes {stable_mosaic.version = 11 : i64} {
  func.func @decoder_kernel(%arg0: i32, %arg1: memref<8x8xf32, #tpu.memory_space<vmem>>, %arg2: memref<8x8xf32, #tpu.memory_space<vmem>>, %arg3: memref<8x128xf32, #tpu.memory_space<vmem>>, %arg4: memref<8x128xf32, #tpu.memory_space<vmem>>, %arg5: memref<1x128xf32, #tpu.memory_space<vmem>>, %arg6: memref<128x128xf32, #tpu.memory_space<vmem>>, %arg7: memref<1x128xf32, #tpu.memory_space<vmem>>, %arg8: memref<128x128xf32, #tpu.memory_space<vmem>>, %arg9: memref<1x128xf32, #tpu.memory_space<vmem>>, %arg10: memref<128x128xf32, #tpu.memory_space<vmem>>, %arg11: memref<1x128xf32, #tpu.memory_space<vmem>>, %arg12: memref<128x128xf32, #tpu.memory_space<vmem>>, %arg13: memref<1x128xf32, #tpu.memory_space<vmem>>, %arg14: memref<8x128xf32, #tpu.memory_space<vmem>>) attributes {dimension_semantics = [#tpu.dimension_semantics<parallel>], iteration_bounds = array<i64: 1>, scalar_prefetch = 0 : i64, scratch_operands = 0 : i64, tpu.core_type = #tpu.core_type<tc>, window_params = [{transform_indices = @transform_0, window_bounds = array<i64: 8, 8>}, {transform_indices = @transform_1, window_bounds = array<i64: 8, 8>}, {pipeline_mode = #tpu.pipeline_mode<synchronous>, transform_indices = @transform_2, window_bounds = array<i64: 8, 128>}, {pipeline_mode = #tpu.pipeline_mode<synchronous>, transform_indices = @transform_3, window_bounds = array<i64: 8, 128>}, {pipeline_mode = #tpu.pipeline_mode<synchronous>, transform_indices = @transform_4, window_bounds = array<i64: 1, 128>}, {pipeline_mode = #tpu.pipeline_mode<synchronous>, transform_indices = @transform_5, window_bounds = array<i64: 128, 128>}, {pipeline_mode = #tpu.pipeline_mode<synchronous>, transform_indices = @transform_6, window_bounds = array<i64: 1, 128>}, {pipeline_mode = #tpu.pipeline_mode<synchronous>, transform_indices = @transform_7, window_bounds = array<i64: 128, 128>}, {pipeline_mode = #tpu.pipeline_mode<synchronous>, transform_indices = @transform_8, window_bounds = array<i64: 1, 128>}, {pipeline_mode = #tpu.pipeline_mode<synchronous>, transform_indices = @transform_9, window_bounds = array<i64: 128, 128>}, {pipeline_mode = #tpu.pipeline_mode<synchronous>, transform_indices = @transform_10, window_bounds = array<i64: 1, 128>}, {pipeline_mode = #tpu.pipeline_mode<synchronous>, transform_indices = @transform_11, window_bounds = array<i64: 128, 128>}, {pipeline_mode = #tpu.pipeline_mode<synchronous>, transform_indices = @transform_12, window_bounds = array<i64: 1, 128>}, {transform_indices = @transform_13, window_bounds = array<i64: 8, 128>}]} {
    %c0 = arith.constant 0 : index
    %c0_0 = arith.constant 0 : index
    %0 = vector.load %arg1[%c0, %c0_0] : memref<8x8xf32, #tpu.memory_space<vmem>>, vector<8x8xf32>
    %c0_1 = arith.constant 0 : index
    %c0_2 = arith.constant 0 : index
    %1 = vector.load %arg3[%c0_1, %c0_2] : memref<8x128xf32, #tpu.memory_space<vmem>>, vector<8x128xf32>
    %cst = arith.constant dense<0.000000e+00> : vector<8x128xf32>
    %2 = tpu.matmul %0, %1, %cst {dimension_numbers = #tpu.dot_dimension_numbers<[1], [0], [0], [1], [0, 0, 1, 1], [], []>} : vector<8x8xf32>, vector<8x128xf32>, vector<8x128xf32> -> vector<8x128xf32>
    %c0_3 = arith.constant 0 : index
    %c0_4 = arith.constant 0 : index
    %3 = vector.load %arg2[%c0_3, %c0_4] : memref<8x8xf32, #tpu.memory_space<vmem>>, vector<8x8xf32>
    %c0_5 = arith.constant 0 : index
    %c0_6 = arith.constant 0 : index
    %4 = vector.load %arg4[%c0_5, %c0_6] : memref<8x128xf32, #tpu.memory_space<vmem>>, vector<8x128xf32>
    %cst_7 = arith.constant dense<0.000000e+00> : vector<8x128xf32>
    %5 = tpu.matmul %3, %4, %cst_7 {dimension_numbers = #tpu.dot_dimension_numbers<[1], [0], [0], [1], [0, 0, 1, 1], [], []>} : vector<8x8xf32>, vector<8x128xf32>, vector<8x128xf32> -> vector<8x128xf32>
    %6 = arith.addf %2, %5 : vector<8x128xf32>
    %c0_8 = arith.constant 0 : index
    %c0_9 = arith.constant 0 : index
    %7 = vector.load %arg5[%c0_8, %c0_9] : memref<1x128xf32, #tpu.memory_space<vmem>>, vector<1x128xf32>
    %8 = vector.broadcast %7 : vector<1x128xf32> to vector<8x128xf32>
    %9 = arith.addf %6, %8 : vector<8x128xf32>
    %cst_10 = arith.constant 0.000000e+00 : f32
    %10 = vector.broadcast %cst_10 : f32 to vector<8x128xf32>
    %11 = arith.cmpf ogt, %9, %10 : vector<8x128xf32>
    %cst_11 = arith.constant 2.000000e-01 : f32
    %12 = vector.broadcast %cst_11 : f32 to vector<8x128xf32>
    %13 = arith.mulf %12, %9 : vector<8x128xf32>
    %14 = arith.select %11, %9, %13 : vector<8x128xi1>, vector<8x128xf32>
    %c0_12 = arith.constant 0 : index
    %c0_13 = arith.constant 0 : index
    %15 = vector.load %arg6[%c0_12, %c0_13] : memref<128x128xf32, #tpu.memory_space<vmem>>, vector<128x128xf32>
    %cst_14 = arith.constant dense<0.000000e+00> : vector<8x128xf32>
    %16 = tpu.matmul %14, %15, %cst_14 {dimension_numbers = #tpu.dot_dimension_numbers<[1], [0], [0], [1], [0, 0, 1, 1], [], []>} : vector<8x128xf32>, vector<128x128xf32>, vector<8x128xf32> -> vector<8x128xf32>
    %c0_15 = arith.constant 0 : index
    %c0_16 = arith.constant 0 : index
    %17 = vector.load %arg7[%c0_15, %c0_16] : memref<1x128xf32, #tpu.memory_space<vmem>>, vector<1x128xf32>
    %18 = vector.broadcast %17 : vector<1x128xf32> to vector<8x128xf32>
    %19 = arith.addf %16, %18 : vector<8x128xf32>
    %cst_17 = arith.constant 0.000000e+00 : f32
    %20 = vector.broadcast %cst_17 : f32 to vector<8x128xf32>
    %21 = arith.cmpf ogt, %19, %20 : vector<8x128xf32>
    %cst_18 = arith.constant 2.000000e-01 : f32
    %22 = vector.broadcast %cst_18 : f32 to vector<8x128xf32>
    %23 = arith.mulf %22, %19 : vector<8x128xf32>
    %24 = arith.select %21, %19, %23 : vector<8x128xi1>, vector<8x128xf32>
    %c0_19 = arith.constant 0 : index
    %c0_20 = arith.constant 0 : index
    %25 = vector.load %arg8[%c0_19, %c0_20] : memref<128x128xf32, #tpu.memory_space<vmem>>, vector<128x128xf32>
    %cst_21 = arith.constant dense<0.000000e+00> : vector<8x128xf32>
    %26 = tpu.matmul %24, %25, %cst_21 {dimension_numbers = #tpu.dot_dimension_numbers<[1], [0], [0], [1], [0, 0, 1, 1], [], []>} : vector<8x128xf32>, vector<128x128xf32>, vector<8x128xf32> -> vector<8x128xf32>
    %c0_22 = arith.constant 0 : index
    %c0_23 = arith.constant 0 : index
    %27 = vector.load %arg9[%c0_22, %c0_23] : memref<1x128xf32, #tpu.memory_space<vmem>>, vector<1x128xf32>
    %28 = vector.broadcast %27 : vector<1x128xf32> to vector<8x128xf32>
    %29 = arith.addf %26, %28 : vector<8x128xf32>
    %cst_24 = arith.constant 0.000000e+00 : f32
    %30 = vector.broadcast %cst_24 : f32 to vector<8x128xf32>
    %31 = arith.cmpf ogt, %29, %30 : vector<8x128xf32>
    %cst_25 = arith.constant 2.000000e-01 : f32
    %32 = vector.broadcast %cst_25 : f32 to vector<8x128xf32>
    %33 = arith.mulf %32, %29 : vector<8x128xf32>
    %34 = arith.select %31, %29, %33 : vector<8x128xi1>, vector<8x128xf32>
    %c0_26 = arith.constant 0 : index
    %c0_27 = arith.constant 0 : index
    %35 = vector.load %arg10[%c0_26, %c0_27] : memref<128x128xf32, #tpu.memory_space<vmem>>, vector<128x128xf32>
    %cst_28 = arith.constant dense<0.000000e+00> : vector<8x128xf32>
    %36 = tpu.matmul %34, %35, %cst_28 {dimension_numbers = #tpu.dot_dimension_numbers<[1], [0], [0], [1], [0, 0, 1, 1], [], []>} : vector<8x128xf32>, vector<128x128xf32>, vector<8x128xf32> -> vector<8x128xf32>
    %c0_29 = arith.constant 0 : index
    %c0_30 = arith.constant 0 : index
    %37 = vector.load %arg11[%c0_29, %c0_30] : memref<1x128xf32, #tpu.memory_space<vmem>>, vector<1x128xf32>
    %38 = vector.broadcast %37 : vector<1x128xf32> to vector<8x128xf32>
    %39 = arith.addf %36, %38 : vector<8x128xf32>
    %cst_31 = arith.constant 0.000000e+00 : f32
    %40 = vector.broadcast %cst_31 : f32 to vector<8x128xf32>
    %41 = arith.cmpf ogt, %39, %40 : vector<8x128xf32>
    %cst_32 = arith.constant 2.000000e-01 : f32
    %42 = vector.broadcast %cst_32 : f32 to vector<8x128xf32>
    %43 = arith.mulf %42, %39 : vector<8x128xf32>
    %44 = arith.select %41, %39, %43 : vector<8x128xi1>, vector<8x128xf32>
    %c0_33 = arith.constant 0 : index
    %c0_34 = arith.constant 0 : index
    %45 = vector.load %arg12[%c0_33, %c0_34] : memref<128x128xf32, #tpu.memory_space<vmem>>, vector<128x128xf32>
    %cst_35 = arith.constant dense<0.000000e+00> : vector<8x128xf32>
    %46 = tpu.matmul %44, %45, %cst_35 {dimension_numbers = #tpu.dot_dimension_numbers<[1], [0], [0], [1], [0, 0, 1, 1], [], []>} : vector<8x128xf32>, vector<128x128xf32>, vector<8x128xf32> -> vector<8x128xf32>
    %c0_36 = arith.constant 0 : index
    %c0_37 = arith.constant 0 : index
    %47 = vector.load %arg13[%c0_36, %c0_37] : memref<1x128xf32, #tpu.memory_space<vmem>>, vector<1x128xf32>
    %48 = vector.broadcast %47 : vector<1x128xf32> to vector<8x128xf32>
    %49 = arith.addf %46, %48 : vector<8x128xf32>
    %cst_38 = arith.constant 0.000000e+00 : f32
    %50 = vector.broadcast %cst_38 : f32 to vector<8x128xf32>
    %51 = arith.maximumf %49, %50 : vector<8x128xf32>
    %c0_39 = arith.constant 0 : index
    %c0_40 = arith.constant 0 : index
    %52 = vector.load %arg14[%c0_39, %c0_40] : memref<8x128xf32, #tpu.memory_space<vmem>>, vector<8x128xf32>
    tpu.vector_store %arg14[%c0_39, %c0_40], %51 {strides = array<i32>} : memref<8x128xf32, #tpu.memory_space<vmem>>, vector<8x128xf32>,
    return
  }
  func.func @transform_0(%arg0: i32) -> (i32, i32) {
    %c0_i32 = arith.constant 0 : i32
    %c0_i32_0 = arith.constant 0 : i32
    return %arg0, %c0_i32 : i32, i32
  }
  func.func @transform_1(%arg0: i32) -> (i32, i32) {
    %c0_i32 = arith.constant 0 : i32
    %c0_i32_0 = arith.constant 0 : i32
    return %arg0, %c0_i32 : i32, i32
  }
  func.func @transform_2(%arg0: i32) -> (i32, i32) {
    %c0_i32 = arith.constant 0 : i32
    %c0_i32_0 = arith.constant 0 : i32
    %c0_i32_1 = arith.constant 0 : i32
    return %c0_i32, %c0_i32_0 : i32, i32
  }
  func.func @transform_3(%arg0: i32) -> (i32, i32) {
    %c0_i32 = arith.constant 0 : i32
    %c0_i32_0 = arith.constant 0 : i32
    %c0_i32_1 = arith.constant 0 : i32
    return %c0_i32, %c0_i32_0 : i32, i32
  }
  func.func @transform_4(%arg0: i32) -> (i32, i32) {
    %c0_i32 = arith.constant 0 : i32
    %c0_i32_0 = arith.constant 0 : i32
    %c0_i32_1 = arith.constant 0 : i32
    return %c0_i32, %c0_i32_0 : i32, i32
  }
  func.func @transform_5(%arg0: i32) -> (i32, i32) {
    %c0_i32 = arith.constant 0 : i32
    %c0_i32_0 = arith.constant 0 : i32
    %c0_i32_1 = arith.constant 0 : i32
    return %c0_i32, %c0_i32_0 : i32, i32
  }
  func.func @transform_6(%arg0: i32) -> (i32, i32) {
    %c0_i32 = arith.constant 0 : i32
    %c0_i32_0 = arith.constant 0 : i32
    %c0_i32_1 = arith.constant 0 : i32
    return %c0_i32, %c0_i32_0 : i32, i32
  }
  func.func @transform_7(%arg0: i32) -> (i32, i32) {
    %c0_i32 = arith.constant 0 : i32
    %c0_i32_0 = arith.constant 0 : i32
    %c0_i32_1 = arith.constant 0 : i32
    return %c0_i32, %c0_i32_0 : i32, i32
  }
  func.func @transform_8(%arg0: i32) -> (i32, i32) {
    %c0_i32 = arith.constant 0 : i32
    %c0_i32_0 = arith.constant 0 : i32
    %c0_i32_1 = arith.constant 0 : i32
    return %c0_i32, %c0_i32_0 : i32, i32
  }
  func.func @transform_9(%arg0: i32) -> (i32, i32) {
    %c0_i32 = arith.constant 0 : i32
    %c0_i32_0 = arith.constant 0 : i32
    %c0_i32_1 = arith.constant 0 : i32
    return %c0_i32, %c0_i32_0 : i32, i32
  }
  func.func @transform_10(%arg0: i32) -> (i32, i32) {
    %c0_i32 = arith.constant 0 : i32
    %c0_i32_0 = arith.constant 0 : i32
    %c0_i32_1 = arith.constant 0 : i32
    return %c0_i32, %c0_i32_0 : i32, i32
  }
  func.func @transform_11(%arg0: i32) -> (i32, i32) {
    %c0_i32 = arith.constant 0 : i32
    %c0_i32_0 = arith.constant 0 : i32
    %c0_i32_1 = arith.constant 0 : i32
    return %c0_i32, %c0_i32_0 : i32, i32
  }
  func.func @transform_12(%arg0: i32) -> (i32, i32) {
    %c0_i32 = arith.constant 0 : i32
    %c0_i32_0 = arith.constant 0 : i32
    %c0_i32_1 = arith.constant 0 : i32
    return %c0_i32, %c0_i32_0 : i32, i32
  }
  func.func @transform_13(%arg0: i32) -> (i32, i32) {
    %c0_i32 = arith.constant 0 : i32
    %c0_i32_0 = arith.constant 0 : i32
    return %arg0, %c0_i32 : i32, i32
  }
}

module attributes {stable_mosaic.version = 11 : i64} {
  func.func @decoder_kernel(%arg0: i32, %arg1: memref<8x8xf32, #tpu.memory_space<vmem>>, %arg2: memref<8x8xf32, #tpu.memory_space<vmem>>, %arg3: memref<8x128xf32, #tpu.memory_space<vmem>>, %arg4: memref<8x128xf32, #tpu.memory_space<vmem>>, %arg5: memref<1x128xf32, #tpu.memory_space<vmem>>, %arg6: memref<128x128xf32, #tpu.memory_space<vmem>>, %arg7: memref<1x128xf32, #tpu.memory_space<vmem>>, %arg8: memref<128x128xf32, #tpu.memory_space<vmem>>, %arg9: memref<1x128xf32, #tpu.memory_space<vmem>>, %arg10: memref<128x128xf32, #tpu.memory_space<vmem>>, %arg11: memref<1x128xf32, #tpu.memory_space<vmem>>, %arg12: memref<128x128xf32, #tpu.memory_space<vmem>>, %arg13: memref<1x128xf32, #tpu.memory_space<vmem>>, %arg14: memref<8x128xf32, #tpu.memory_space<vmem>>) attributes {dimension_semantics = [#tpu.dimension_semantics<parallel>], iteration_bounds = array<i64: 1>, scalar_prefetch = 0 : i64, scratch_operands = 0 : i64, tpu.core_type = #tpu.core_type<tc>, window_params = [{transform_indices = @transform_0, window_bounds = array<i64: 8, 8>}, {transform_indices = @transform_1, window_bounds = array<i64: 8, 8>}, {pipeline_mode = #tpu.pipeline_mode<synchronous>, transform_indices = @transform_2, window_bounds = array<i64: 8, 128>}, {pipeline_mode = #tpu.pipeline_mode<synchronous>, transform_indices = @transform_3, window_bounds = array<i64: 8, 128>}, {pipeline_mode = #tpu.pipeline_mode<synchronous>, transform_indices = @transform_4, window_bounds = array<i64: 1, 128>}, {pipeline_mode = #tpu.pipeline_mode<synchronous>, transform_indices = @transform_5, window_bounds = array<i64: 128, 128>}, {pipeline_mode = #tpu.pipeline_mode<synchronous>, transform_indices = @transform_6, window_bounds = array<i64: 1, 128>}, {pipeline_mode = #tpu.pipeline_mode<synchronous>, transform_indices = @transform_7, window_bounds = array<i64: 128, 128>}, {pipeline_mode = #tpu.pipeline_mode<synchronous>, transform_indices = @transform_8, window_bounds = array<i64: 1, 128>}, {pipeline_mode = #tpu.pipeline_mode<synchronous>, transform_indices = @transform_9, window_bounds = array<i64: 128, 128>}, {pipeline_mode = #tpu.pipeline_mode<synchronous>, transform_indices = @transform_10, window_bounds = array<i64: 1, 128>}, {pipeline_mode = #tpu.pipeline_mode<synchronous>, transform_indices = @transform_11, window_bounds = array<i64: 128, 128>}, {pipeline_mode = #tpu.pipeline_mode<synchronous>, transform_indices = @transform_12, window_bounds = array<i64: 1, 128>}, {transform_indices = @transform_13, window_bounds = array<i64: 8, 128>}]} {
    %c0 = arith.constant 0 : index
    %c0_0 = arith.constant 0 : index
    %0 = vector.load %arg1[%c0, %c0_0] : memref<8x8xf32, #tpu.memory_space<vmem>>, vector<8x8xf32>
    %c0_1 = arith.constant 0 : index
    %c0_2 = arith.constant 0 : index
    %1 = vector.load %arg3[%c0_1, %c0_2] : memref<8x128xf32, #tpu.memory_space<vmem>>, vector<8x128xf32>
    %cst = arith.constant dense<0.000000e+00> : vector<8x128xf32>
    %2 = tpu.matmul %0, %1, %cst {dimension_numbers = #tpu.dot_dimension_numbers<[1], [0], [0], [1], [0, 0, 1, 1], [], []>} : vector<8x8xf32>, vector<8x128xf32>, vector<8x128xf32> -> vector<8x128xf32>
    %c0_3 = arith.constant 0 : index
    %c0_4 = arith.constant 0 : index
    %3 = vector.load %arg2[%c0_3, %c0_4] : memref<8x8xf32, #tpu.memory_space<vmem>>, vector<8x8xf32>
    %c0_5 = arith.constant 0 : index
    %c0_6 = arith.constant 0 : index
    %4 = vector.load %arg4[%c0_5, %c0_6] : memref<8x128xf32, #tpu.memory_space<vmem>>, vector<8x128xf32>
    %cst_7 = arith.constant dense<0.000000e+00> : vector<8x128xf32>
    %5 = tpu.matmul %3, %4, %cst_7 {dimension_numbers = #tpu.dot_dimension_numbers<[1], [0], [0], [1], [0, 0, 1, 1], [], []>} : vector<8x8xf32>, vector<8x128xf32>, vector<8x128xf32> -> vector<8x128xf32>
    %6 = arith.addf %2, %5 : vector<8x128xf32>
    %c0_8 = arith.constant 0 : index
    %c0_9 = arith.constant 0 : index
    %7 = vector.load %arg5[%c0_8, %c0_9] : memref<1x128xf32, #tpu.memory_space<vmem>>, vector<1x128xf32>
    %8 = vector.broadcast %7 : vector<1x128xf32> to vector<8x128xf32>
    %9 = arith.addf %6, %8 : vector<8x128xf32>
    %cst_10 = arith.constant 0.000000e+00 : f32
    %10 = vector.broadcast %cst_10 : f32 to vector<8x128xf32>
    %11 = arith.cmpf ogt, %9, %10 : vector<8x128xf32>
    %cst_11 = arith.constant 2.000000e-01 : f32
    %12 = vector.broadcast %cst_11 : f32 to vector<8x128xf32>
    %13 = arith.mulf %12, %9 : vector<8x128xf32>
    %14 = arith.select %11, %9, %13 : vector<8x128xi1>, vector<8x128xf32>
    %c0_12 = arith.constant 0 : index
    %c0_13 = arith.constant 0 : index
    %15 = vector.load %arg6[%c0_12, %c0_13] : memref<128x128xf32, #tpu.memory_space<vmem>>, vector<128x128xf32>
    %cst_14 = arith.constant dense<0.000000e+00> : vector<8x128xf32>
    %16 = tpu.matmul %14, %15, %cst_14 {dimension_numbers = #tpu.dot_dimension_numbers<[1], [0], [0], [1], [0, 0, 1, 1], [], []>} : vector<8x128xf32>, vector<128x128xf32>, vector<8x128xf32> -> vector<8x128xf32>
    %c0_15 = arith.constant 0 : index
    %c0_16 = arith.constant 0 : index
    %17 = vector.load %arg7[%c0_15, %c0_16] : memref<1x128xf32, #tpu.memory_space<vmem>>, vector<1x128xf32>
    %18 = vector.broadcast %17 : vector<1x128xf32> to vector<8x128xf32>
    %19 = arith.addf %16, %18 : vector<8x128xf32>
    %cst_17 = arith.constant 0.000000e+00 : f32
    %20 = vector.broadcast %cst_17 : f32 to vector<8x128xf32>
    %21 = arith.cmpf ogt, %19, %20 : vector<8x128xf32>
    %cst_18 = arith.constant 2.000000e-01 : f32
    %22 = vector.broadcast %cst_18 : f32 to vector<8x128xf32>
    %23 = arith.mulf %22, %19 : vector<8x128xf32>
    %24 = arith.select %21, %19, %23 : vector<8x128xi1>, vector<8x128xf32>
    %c0_19 = arith.constant 0 : index
    %c0_20 = arith.constant 0 : index
    %25 = vector.load %arg8[%c0_19, %c0_20] : memref<128x128xf32, #tpu.memory_space<vmem>>, vector<128x128xf32>
    %cst_21 = arith.constant dense<0.000000e+00> : vector<8x128xf32>
    %26 = tpu.matmul %24, %25, %cst_21 {dimension_numbers = #tpu.dot_dimension_numbers<[1], [0], [0], [1], [0, 0, 1, 1], [], []>} : vector<8x128xf32>, vector<128x128xf32>, vector<8x128xf32> -> vector<8x128xf32>
    %c0_22 = arith.constant 0 : index
    %c0_23 = arith.constant 0 : index
    %27 = vector.load %arg9[%c0_22, %c0_23] : memref<1x128xf32, #tpu.memory_space<vmem>>, vector<1x128xf32>
    %28 = vector.broadcast %27 : vector<1x128xf32> to vector<8x128xf32>
    %29 = arith.addf %26, %28 : vector<8x128xf32>
    %cst_24 = arith.constant 0.000000e+00 : f32
    %30 = vector.broadcast %cst_24 : f32 to vector<8x128xf32>
    %31 = arith.cmpf ogt, %29, %30 : vector<8x128xf32>
    %cst_25 = arith.constant 2.000000e-01 : f32
    %32 = vector.broadcast %cst_25 : f32 to vector<8x128xf32>
    %33 = arith.mulf %32, %29 : vector<8x128xf32>
    %34 = arith.select %31, %29, %33 : vector<8x128xi1>, vector<8x128xf32>
    %c0_26 = arith.constant 0 : index
    %c0_27 = arith.constant 0 : index
    %35 = vector.load %arg10[%c0_26, %c0_27] : memref<128x128xf32, #tpu.memory_space<vmem>>, vector<128x128xf32>
    %cst_28 = arith.constant dense<0.000000e+00> : vector<8x128xf32>
    %36 = tpu.matmul %34, %35, %cst_28 {dimension_numbers = #tpu.dot_dimension_numbers<[1], [0], [0], [1], [0, 0, 1, 1], [], []>} : vector<8x128xf32>, vector<128x128xf32>, vector<8x128xf32> -> vector<8x128xf32>
    %c0_29 = arith.constant 0 : index
    %c0_30 = arith.constant 0 : index
    %37 = vector.load %arg11[%c0_29, %c0_30] : memref<1x128xf32, #tpu.memory_space<vmem>>, vector<1x128xf32>
    %38 = vector.broadcast %37 : vector<1x128xf32> to vector<8x128xf32>
    %39 = arith.addf %36, %38 : vector<8x128xf32>
    %cst_31 = arith.constant 0.000000e+00 : f32
    %40 = vector.broadcast %cst_31 : f32 to vector<8x128xf32>
    %41 = arith.cmpf ogt, %39, %40 : vector<8x128xf32>
    %cst_32 = arith.constant 2.000000e-01 : f32
    %42 = vector.broadcast %cst_32 : f32 to vector<8x128xf32>
    %43 = arith.mulf %42, %39 : vector<8x128xf32>
    %44 = arith.select %41, %39, %43 : vector<8x128xi1>, vector<8x128xf32>
    %c0_33 = arith.constant 0 : index
    %c0_34 = arith.constant 0 : index
    %45 = vector.load %arg12[%c0_33, %c0_34] : memref<128x128xf32, #tpu.memory_space<vmem>>, vector<128x128xf32>
    %cst_35 = arith.constant dense<0.000000e+00> : vector<8x128xf32>
    %46 = tpu.matmul %44, %45, %cst_35 {dimension_numbers = #tpu.dot_dimension_numbers<[1], [0], [0], [1], [0, 0, 1, 1], [], []>} : vector<8x128xf32>, vector<128x128xf32>, vector<8x128xf32> -> vector<8x128xf32>
    %c0_36 = arith.constant 0 : index
    %c0_37 = arith.constant 0 : index
    %47 = vector.load %arg13[%c0_36, %c0_37] : memref<1x128xf32, #tpu.memory_space<vmem>>, vector<1x128xf32>
    %48 = vector.broadcast %47 : vector<1x128xf32> to vector<8x128xf32>
    %49 = arith.addf %46, %48 : vector<8x128xf32>
    %cst_38 = arith.constant 0.000000e+00 : f32
    %50 = vector.broadcast %cst_38 : f32 to vector<8x128xf32>
    %51 = arith.maximumf %49, %50 : vector<8x128xf32>
    %c0_39 = arith.constant 0 : index
    %c0_40 = arith.constant 0 : index
    %52 = vector.load %arg14[%c0_39, %c0_40] : memref<8x128xf32, #tpu.memory_space<vmem>>, vector<8x128xf32>
    tpu.vector_store %arg14[%c0_39, %c0_40], %51 {strides = array<i32>} : memref<8x128xf32, #tpu.memory_space<vmem>>, vector<8x128xf32>,
    return
  }
  func.func @transform_0(%arg0: i32) -> (i32, i32) {
    %c0_i32 = arith.constant 0 : i32
    %c0_i32_0 = arith.constant 0 : i32
    return %arg0, %c0_i32 : i32, i32
  }
  func.func @transform_1(%arg0: i32) -> (i32, i32) {
    %c0_i32 = arith.constant 0 : i32
    %c0_i32_0 = arith.constant 0 : i32
    return %arg0, %c0_i32 : i32, i32
  }
  func.func @transform_2(%arg0: i32) -> (i32, i32) {
    %c0_i32 = arith.constant 0 : i32
    %c0_i32_0 = arith.constant 0 : i32
    %c0_i32_1 = arith.constant 0 : i32
    return %c0_i32, %c0_i32_0 : i32, i32
  }
  func.func @transform_3(%arg0: i32) -> (i32, i32) {
    %c0_i32 = arith.constant 0 : i32
    %c0_i32_0 = arith.constant 0 : i32
    %c0_i32_1 = arith.constant 0 : i32
    return %c0_i32, %c0_i32_0 : i32, i32
  }
  func.func @transform_4(%arg0: i32) -> (i32, i32) {
    %c0_i32 = arith.constant 0 : i32
    %c0_i32_0 = arith.constant 0 : i32
    %c0_i32_1 = arith.constant 0 : i32
    return %c0_i32, %c0_i32_0 : i32, i32
  }
  func.func @transform_5(%arg0: i32) -> (i32, i32) {
    %c0_i32 = arith.constant 0 : i32
    %c0_i32_0 = arith.constant 0 : i32
    %c0_i32_1 = arith.constant 0 : i32
    return %c0_i32, %c0_i32_0 : i32, i32
  }
  func.func @transform_6(%arg0: i32) -> (i32, i32) {
    %c0_i32 = arith.constant 0 : i32
    %c0_i32_0 = arith.constant 0 : i32
    %c0_i32_1 = arith.constant 0 : i32
    return %c0_i32, %c0_i32_0 : i32, i32
  }
  func.func @transform_7(%arg0: i32) -> (i32, i32) {
    %c0_i32 = arith.constant 0 : i32
    %c0_i32_0 = arith.constant 0 : i32
    %c0_i32_1 = arith.constant 0 : i32
    return %c0_i32, %c0_i32_0 : i32, i32
  }
  func.func @transform_8(%arg0: i32) -> (i32, i32) {
    %c0_i32 = arith.constant 0 : i32
    %c0_i32_0 = arith.constant 0 : i32
    %c0_i32_1 = arith.constant 0 : i32
    return %c0_i32, %c0_i32_0 : i32, i32
  }
  func.func @transform_9(%arg0: i32) -> (i32, i32) {
    %c0_i32 = arith.constant 0 : i32
    %c0_i32_0 = arith.constant 0 : i32
    %c0_i32_1 = arith.constant 0 : i32
    return %c0_i32, %c0_i32_0 : i32, i32
  }
  func.func @transform_10(%arg0: i32) -> (i32, i32) {
    %c0_i32 = arith.constant 0 : i32
    %c0_i32_0 = arith.constant 0 : i32
    %c0_i32_1 = arith.constant 0 : i32
    return %c0_i32, %c0_i32_0 : i32, i32
  }
  func.func @transform_11(%arg0: i32) -> (i32, i32) {
    %c0_i32 = arith.constant 0 : i32
    %c0_i32_0 = arith.constant 0 : i32
    %c0_i32_1 = arith.constant 0 : i32
    return %c0_i32, %c0_i32_0 : i32, i32
  }
  func.func @transform_12(%arg0: i32) -> (i32, i32) {
    %c0_i32 = arith.constant 0 : i32
    %c0_i32_0 = arith.constant 0 : i32
    %c0_i32_1 = arith.constant 0 : i32
    return %c0_i32, %c0_i32_0 : i32, i32
  }
  func.func @transform_13(%arg0: i32) -> (i32, i32) {
    %c0_i32 = arith.constant 0 : i32
    %c0_i32_0 = arith.constant 0 : i32
    return %arg0, %c0_i32 : i32, i32
  }
}

</mosaic_0001>

<bundles_post_ra>
// kernel: tpu_custom_call.1
= control target key start
LH: loop header
LB: loop body
LE: loop exit
PB: predicated region body
PF: predicated region fallthrough
CT: control target
= control target key end

     0   :  { %18 = vsyncpa [#allocation3], 0  ;;  %s1490_s0 = inlined_call_operand.hbm [shape: f32[8,8], index: 0, kind: input, shape index: {}]   ;;  %s1491_s1 = inlined_call_operand.hbm [shape: f32[8,8], index: 1, kind: input, shape index: {}]   ;;  %s1492_s2 = inlined_call_operand.hbm [shape: f32[8,128], index: 2, kind: input, shape index: {}]   ;;  %s1493_s3 = inlined_call_operand.vmem [shape: f32[8,128], index: 3, kind: input, shape index: {}]   ;;  %s1494_s4 = inlined_call_operand.vmem [shape: f32[1,128], index: 4, kind: input, shape index: {}]   ;;  %s1495_s5 = inlined_call_operand.hbm [shape: f32[128,128], index: 5, kind: input, shape index: {}]   ;;  %s1496_s6 = inlined_call_operand.vmem [shape: f32[1,128], index: 6, kind: input, shape index: {}]   ;;  %s1497_s7 = inlined_call_operand.hbm [shape: f32[128,128], index: 7, kind: input, shape index: {}]   ;;  %s1498_s8 = inlined_call_operand.vmem [shape: f32[1,128], index: 8, kind: input, shape index: {}]   ;;  %s1499_s9 = inlined_call_operand.hbm [shape: f32[128,128], index: 9, kind: input, shape index: {}]   ;;  %s1500_s10 = inlined_call_operand.vmem [shape: f32[1,128], index: 10, kind: input, shape index: {}]   ;;  %s1501_s11 = inlined_call_operand.hbm [shape: f32[128,128], index: 11, kind: input, shape index: {}]   ;;  %s1502_s12 = inlined_call_operand.vmem [shape: f32[1,128], index: 12, kind: input, shape index: {}]   ;;  %s1503_s13 = inlined_call_operand.hbm [shape: f32[8,128], index: 13, kind: output, shape index: {}]  }
   0x1   :  { %19 = vsyncpa [#allocation6], 0 }
   0x2   :  { %20 = vsyncpa [#allocation9], 0 }
   0x3   :  { %21 = vsyncpa [#allocation12], 0 }
   0x4   :  { %22 = vsyncpa [#allocation4], 0  ;;  %s1221_s25 = smov [#allocation5]   ;;  %s1222_s27 = smov [#allocation8]  }
   0x5   :  { %s39_s26 = sshll.u32 %s1221_s25, 4  ;;  %s62_s28 = sshll.u32 %s1222_s27, 4  ;;  %s40_s26 = int_to_ptr.vmem [resolvable:$true] %s39_s26  ;;  %s1304_s28 = int_to_ptr.vmem [resolvable:$true] %s62_s28 }
   0x6   :  { %s1035_s14 = scalar_lea.hbm %s1491_s1, 128 }
   0x7   :  { %p1036_p0 = scmp.ne.s32.totalorder %s1491_s1, %s1035_s14  ;;  %p1039_p1 = scmp.lt.u32.totalorder %s1035_s14, %s1491_s1 }
   0x9   :  { %p1041_p2 = pnand %p1039_p1, %p1036_p0 }
   0xb   :  { %1044 = shalt.err (!%p1041_p2)
}
   0xc   :  { %s1045_s19 = scalar_lea.vmem %s40_s26, 128  ;;  %p1050_p4 = scmp.lt.s32.totalorder %s40_s26, %s40_s26 }
   0xd   :  { %p1046_p3 = scmp.ne.s32.totalorder %s40_s26, %s1045_s19  ;;  %p1051_p5 = scmp.lt.s32.totalorder %s1045_s19, %s1045_s19 }
   0xf   :  { %p1052_p6 = por %p1051_p5, %p1050_p4 }
  0x11   :  { %p1053_p7 = pnand %p1052_p6, %p1046_p3 }
  0x13   :  { %1056 = shalt.err (!%p1053_p7)
}
  0x14   :  { %42 = dma.hbm_to_vmem [thread:$0]  %s1491_s1, 128, %s40_s26, [#allocation6]  }
  0x15   :  { %s1057_s24 = scalar_lea.hbm %s1495_s5, 2048 }
  0x16   :  { %p1058_p8 = scmp.ne.s32.totalorder %s1495_s5, %s1057_s24  ;;  %p1061_p9 = scmp.lt.u32.totalorder %s1057_s24, %s1495_s5 }
  0x18   :  { %p1063_p10 = pnand %p1061_p9, %p1058_p8 }
  0x1a   :  { %1066 = shalt.err (!%p1063_p10)
}
  0x1b   :  { %s1067_s14 = scalar_lea.vmem %s1304_s28, 2048  ;;  %p1072_p12 = scmp.lt.s32.totalorder %s1304_s28, %s1304_s28 }
  0x1c   :  { %p1068_p11 = scmp.ne.s32.totalorder %s1304_s28, %s1067_s14  ;;  %p1073_p13 = scmp.lt.s32.totalorder %s1067_s14, %s1067_s14 }
  0x1e   :  { %p1074_p0 = por %p1073_p13, %p1072_p12 }
  0x20   :  { %p1075_p1 = pnand %p1074_p0, %p1068_p11 }
  0x22   :  { %1078 = shalt.err (!%p1075_p1)
}
  0x23   :  { %s1223_s1 = smov 128   ;;  %s1224_s26 = smov 8  }
  0x24   :  { %68 = dma.hbm_to_vmem [thread:$0]  %s1495_s5, 2048, %s1304_s28, [#allocation9], %s1223_s1, %s1223_s1, %s1224_s26  }
  0x25   :  { %s1225_s17 = smov [#allocation11]   ;;  %s1226_s19 = smov [#allocation2]  }
  0x26   :  { %s90_s18 = sshll.u32 %s1225_s17, 4  ;;  %s29_s20 = sshll.u32 %s1226_s19, 4  ;;  %s91_s18 = int_to_ptr.vmem [resolvable:$true] %s90_s18  ;;  %s30_s20 = int_to_ptr.vmem [resolvable:$true] %s29_s20 }
  0x27   :  { %s1079_s23 = scalar_lea.hbm %s1499_s9, 2048 }
  0x28   :  { %p1080_p2 = scmp.ne.s32.totalorder %s1499_s9, %s1079_s23  ;;  %p1083_p3 = scmp.lt.u32.totalorder %s1079_s23, %s1499_s9 }
  0x2a   :  { %p1085_p4 = pnand %p1083_p3, %p1080_p2 }
  0x2c   :  { %1088 = shalt.err (!%p1085_p4)
}
  0x2d   :  { %s1089_s5 = scalar_lea.vmem %s91_s18, 2048  ;;  %p1094_p6 = scmp.lt.s32.totalorder %s91_s18, %s91_s18 }
  0x2e   :  { %p1090_p5 = scmp.ne.s32.totalorder %s91_s18, %s1089_s5  ;;  %p1095_p7 = scmp.lt.s32.totalorder %s1089_s5, %s1089_s5 }
  0x30   :  { %p1096_p8 = por %p1095_p7, %p1094_p6 }
  0x32   :  { %p1097_p9 = pnand %p1096_p8, %p1090_p5 }
  0x34   :  { %1100 = shalt.err (!%p1097_p9)
}
  0x35   :  { %96 = dma.hbm_to_vmem [thread:$0]  %s1499_s9, 2048, %s91_s18, [#allocation12], %s1223_s1, %s1223_s1, %s1224_s26  }
  0x36   :  { %s1101_s16 = scalar_lea.hbm %s1490_s0, 128 }
  0x37   :  { %p1102_p10 = scmp.ne.s32.totalorder %s1490_s0, %s1101_s16  ;;  %p1105_p11 = scmp.lt.u32.totalorder %s1101_s16, %s1490_s0 }
  0x39   :  { %p1107_p12 = pnand %p1105_p11, %p1102_p10 }
  0x3b   :  { %1110 = shalt.err (!%p1107_p12)
}
  0x3c   :  { %s1111_s23 = scalar_lea.vmem %s30_s20, 128  ;;  %p1116_p0 = scmp.lt.s32.totalorder %s30_s20, %s30_s20 }
  0x3d   :  { %p1112_p13 = scmp.ne.s32.totalorder %s30_s20, %s1111_s23  ;;  %p1117_p1 = scmp.lt.s32.totalorder %s1111_s23, %s1111_s23 }
  0x3f   :  { %p1118_p2 = por %p1117_p1, %p1116_p0 }
  0x41   :  { %p1119_p3 = pnand %p1118_p2, %p1112_p13 }
  0x43   :  { %1122 = shalt.err (!%p1119_p3)
}
  0x44   :  { %32 = dma.hbm_to_vmem [thread:$0]  %s1490_s0, 128, %s30_s20, [#allocation3]  }
  0x45   :  { %s1227_s24 = smov [#allocation7]   ;;  %s1228_s27 = smov [#allocation10]  }
  0x46   :  { %s49_s25 = sshll.u32 %s1227_s24, 4  ;;  %s76_s29 = sshll.u32 %s1228_s27, 4  ;;  %s50_s25 = int_to_ptr.vmem [resolvable:$true] %s49_s25  ;;  %s1365_s29 = int_to_ptr.vmem [resolvable:$true] %s76_s29 }
  0x47   :  { %s1123_s30 = scalar_lea.hbm %s1492_s2, 128 }
  0x48   :  { %p1124_p4 = scmp.ne.s32.totalorder %s1492_s2, %s1123_s30  ;;  %p1127_p5 = scmp.lt.u32.totalorder %s1123_s30, %s1492_s2 }
  0x4a   :  { %p1129_p6 = pnand %p1127_p5, %p1124_p4 }
  0x4c   :  { %1132 = shalt.err (!%p1129_p6)
}
  0x4d   :  { %s1133_s0 = scalar_lea.vmem %s50_s25, 128  ;;  %p1138_p8 = scmp.lt.s32.totalorder %s50_s25, %s50_s25 }
  0x4e   :  { %p1134_p7 = scmp.ne.s32.totalorder %s50_s25, %s1133_s0  ;;  %p1139_p9 = scmp.lt.s32.totalorder %s1133_s0, %s1133_s0 }
  0x50   :  { %p1140_p10 = por %p1139_p9, %p1138_p8 }
  0x52   :  { %p1141_p11 = pnand %p1140_p10, %p1134_p7 }
  0x54   :  { %1144 = shalt.err (!%p1141_p11)
}
  0x55   :  { %52 = dma.hbm_to_vmem [thread:$0]  %s1492_s2, 128, %s50_s25, [#allocation6]  }
  0x56   :  { %s1145_s23 = scalar_lea.hbm %s1497_s7, 2048 }
  0x57   :  { %p1146_p12 = scmp.ne.s32.totalorder %s1497_s7, %s1145_s23  ;;  %p1149_p13 = scmp.lt.u32.totalorder %s1145_s23, %s1497_s7 }
  0x59   :  { %p1151_p0 = pnand %p1149_p13, %p1146_p12 }
  0x5b   :  { %1154 = shalt.err (!%p1151_p0)
}
  0x5c   :  { %s1155_s5 = scalar_lea.vmem %s1365_s29, 2048  ;;  %p1160_p2 = scmp.lt.s32.totalorder %s1365_s29, %s1365_s29 }
  0x5d   :  { %p1156_p1 = scmp.ne.s32.totalorder %s1365_s29, %s1155_s5  ;;  %p1161_p3 = scmp.lt.s32.totalorder %s1155_s5, %s1155_s5 }
  0x5f   :  { %p1162_p4 = por %p1161_p3, %p1160_p2 }
  0x61   :  { %p1163_p5 = pnand %p1162_p4, %p1156_p1 }
  0x63   :  { %1166 = shalt.err (!%p1163_p5)
}
  0x64   :  { %82 = dma.hbm_to_vmem [thread:$0]  %s1497_s7, 2048, %s1365_s29, [#allocation9], %s1223_s1, %s1223_s1, %s1224_s26  }
  0x65   :  { %s1229_s28 = smov [#allocation13]   ;;  %s1167_s16 = scalar_lea.hbm %s1501_s11, 2048 }
  0x66   :  { %s104_s30 = sshll.u32 %s1229_s28, 4  ;;  %p1168_p6 = scmp.ne.s32.totalorder %s1501_s11, %s1167_s16  ;;  %s105_s30 = int_to_ptr.vmem [resolvable:$true] %s104_s30 }
  0x67   :  { %p1171_p7 = scmp.lt.u32.totalorder %s1167_s16, %s1501_s11 }
  0x69   :  { %p1173_p8 = pnand %p1171_p7, %p1168_p6 }
  0x6b   :  { %1176 = shalt.err (!%p1173_p8)
}
  0x6c   :  { %s1177_s21 = scalar_lea.vmem %s105_s30, 2048  ;;  %p1182_p10 = scmp.lt.s32.totalorder %s105_s30, %s105_s30 }
  0x6d   :  { %p1178_p9 = scmp.ne.s32.totalorder %s105_s30, %s1177_s21  ;;  %p1183_p11 = scmp.lt.s32.totalorder %s1177_s21, %s1177_s21 }
  0x6f   :  { %p1184_p12 = por %p1183_p11, %p1182_p10 }
  0x71   :  { %p1185_p13 = pnand %p1184_p12, %p1178_p9 }
  0x73   :  { %1188 = shalt.err (!%p1185_p13)
}
  0x74   :  { %110 = dma.hbm_to_vmem [thread:$0]  %s1501_s11, 2048, %s105_s30, [#allocation12], %s1223_s1, %s1223_s1, %s1224_s26  }
  0x75   :  { %1211 = dma.done.wait [#allocation3], 128  }
  0x76   :  { %1212 = vsyncadd [#allocation3], 4294967168 }
  0x77   :  { %1213 = dma.done.wait [#allocation6], 256  }
  0x78   :  { %1214 = vsyncadd [#allocation6], 4294967040 }
  0x79   :  { %1215 = dma.done.wait [#allocation9], 4096  }
  0x7a   :  { %1216 = vsyncadd [#allocation9], 4294963200 }
  0x7b   :  { %1217 = dma.done.wait [#allocation12], 4096  }
  0x7c   :  { %1218 = vsyncadd [#allocation12], 4294963200  ;;  %v1230_v0 = vmov 0.0   ;;  %vm1231_vm0 = vmmov 0   ;;  %vm138_vm1 = vcmask 64512   ;;  %v137_v1 = vld [vmem:[%s1493_s3] sm:$0xff] }
  0x7d   :  { %776 = vmatprep.subr.mxu0 %v1230_v0  ;;  %781 = vmatprep.subr.mxu1 %v1230_v0  ;;  %v135_v2 = vld [vmem:[#allocation7] sm:$0xff]  ;;  %v136_v3 = vld [vmem:[#allocation5] sm:$0xff]  ;;  %v134_v4 = vld [vmem:[#allocation2] sm:$0xff]  ;;  %v1232_v10 = vmov 0.0|0.0   ;;  %s1233_s27 = smov [#allocation14]  }
  0x7e   :  { %778 = vmatprep.mubr.msk.f32.mxu0 %vm1231_vm0, %v1230_v0  ;;  %783 = vmatprep.mubr.msk.f32.mxu1 %vm1231_vm0, %v1230_v0  ;;  %v296_v5 = vld [vmem:[#allocation8] sm:$0xff]  ;;  %v297_v6 = vld [vmem:[#allocation8 + $0x8] sm:$0xff]  ;;  %v298_v8 = vld [vmem:[#allocation8 + $0x10] sm:$0xff]  ;;  %s685_s5 = sshll.u32 %s1233_s27, 4  ;;  %s686_s5 = int_to_ptr.vmem [resolvable:$true] %s685_s5 }
  0x7f   :  { %777 = vmatpush3.msra.mxu0 %v137_v1  ;;  %782 = vmatpush3.msra.mxu1 %v135_v2  ;;  %v927_v7 = vpack.c.bf16 %v297_v6, %v296_v5  ;;  %v299_v9 = vld [vmem:[#allocation8 + $0x18] sm:$0xff]  ;;  %v300_v12 = vld [vmem:[#allocation8 + $0x20] sm:$0xff]  ;;  %v301_v13 = vld [vmem:[#allocation8 + $0x28] sm:$0xff]  ;;  %p1194_p1 = scmp.lt.s32.totalorder %s686_s5, %s686_s5 }
  0x80   :  { %779 = vmatmul.mubr.msk.f32.vlgmr.msra.gmra.mrb[0].mxu0 %vm138_vm1, %v136_v3  ;;  %784 = vmatmul.mubr.msk.f32.vlgmr.msra.gmra.mrb[0].mxu1 %vm138_vm1, %v134_v4  ;;  %v930_v11 = vpack.c.bf16 %v299_v9, %v298_v8  ;;  %v933_v14 = vpack.c.bf16 %v301_v13, %v300_v12  ;;  %v302_v15 = vld [vmem:[#allocation8 + $0x30] sm:$0xff]  ;;  %v303_v16 = vld [vmem:[#allocation8 + $0x38] sm:$0xff]  ;;  %v304_v18 = vld [vmem:[#allocation8 + $0x40] sm:$0xff] }
  0x81   :  { %926 = vmatprep.subr.bf16.mxu0 %v1232_v10  ;;  %818 = vmatprep.mubr.msk.f32.mxu0 %vm1231_vm0, %v1230_v0  ;;  %v936_v17 = vpack.c.bf16 %v303_v16, %v302_v15  ;;  %v305_v19 = vld [vmem:[#allocation8 + $0x48] sm:$0xff]  ;;  %v306_v21 = vld [vmem:[#allocation8 + $0x50] sm:$0xff]  ;;  %v307_v22 = vld [vmem:[#allocation8 + $0x58] sm:$0xff] }
  0x82   :  { %928 = vmatpush3.bf16.msra.mxu0 %v927_v7  ;;  %950 = vmatprep.subr.bf16.mxu1 %v1232_v10  ;;  %v939_v20 = vpack.c.bf16 %v305_v19, %v304_v18  ;;  %v942_v23 = vpack.c.bf16 %v307_v22, %v306_v21  ;;  %v308_v24 = vld [vmem:[#allocation8 + $0x60] sm:$0xff]  ;;  %v309_v25 = vld [vmem:[#allocation8 + $0x68] sm:$0xff]  ;;  %v310_v27 = vld [vmem:[#allocation8 + $0x70] sm:$0xff] }
  0x83   :  { %929 = vmatprep.subr.bf16.mxu0 %v1232_v10  ;;  %853 = vmatprep.mubr.msk.f32.mxu1 %vm1231_vm0, %v1230_v0  ;;  %v945_v26 = vpack.c.bf16 %v309_v25, %v308_v24  ;;  %v311_v28 = vld [vmem:[#allocation8 + $0x78] sm:$0xff]  ;;  %v392_v30 = vld [vmem:[#allocation10] sm:$0xff]  ;;  %v393_v31 = vld [vmem:[#allocation10 + $0x8] sm:$0xff] }
  0x84   :  { %v948_v29 = vpack.c.bf16 %v311_v28, %v310_v27  ;;  %v394_v32 = vld [vmem:[#allocation10 + $0x10] sm:$0xff]  ;;  %v951_v33 = vpack.c.bf16 %v393_v31, %v392_v30  ;;  %v395_v34 = vld [vmem:[#allocation10 + $0x18] sm:$0xff]  ;;  %v396_v36 = vld [vmem:[#allocation10 + $0x20] sm:$0xff] }
  0x85   :  { %v954_v35 = vpack.c.bf16 %v395_v34, %v394_v32  ;;  %v397_v37 = vld [vmem:[#allocation10 + $0x28] sm:$0xff]  ;;  %v398_v39 = vld [vmem:[#allocation10 + $0x30] sm:$0xff]  ;;  %v399_v40 = vld [vmem:[#allocation10 + $0x38] sm:$0xff] }
  0x86   :  { %931 = vmatpush3.bf16.msra.mxu0 %v930_v11  ;;  %952 = vmatpush3.bf16.msra.mxu1 %v951_v33  ;;  %v957_v38 = vpack.c.bf16 %v397_v37, %v396_v36  ;;  %v960_v41 = vpack.c.bf16 %v399_v40, %v398_v39  ;;  %v400_v42 = vld [vmem:[#allocation10 + $0x40] sm:$0xff]  ;;  %v401_v43 = vld [vmem:[#allocation10 + $0x48] sm:$0xff]  ;;  %v402_v45 = vld [vmem:[#allocation10 + $0x50] sm:$0xff] }
  0x87   :  { %932 = vmatprep.subr.bf16.mxu0 %v1232_v10  ;;  %953 = vmatprep.subr.bf16.mxu1 %v1232_v10  ;;  %v963_v44 = vpack.c.bf16 %v401_v43, %v400_v42  ;;  %v403_v46 = vld [vmem:[#allocation10 + $0x58] sm:$0xff]  ;;  %v404_v48 = vld [vmem:[#allocation10 + $0x60] sm:$0xff]  ;;  %v405_v49 = vld [vmem:[#allocation10 + $0x68] sm:$0xff] }
  0x88   :  { %v966_v47 = vpack.c.bf16 %v403_v46, %v402_v45  ;;  %v969_v50 = vpack.c.bf16 %v405_v49, %v404_v48  ;;  %v699_v53 = vld [vmem:[%s1494_s4] ss:$0 sm:$0xff]  ;;  %v406_v60 = vld [vmem:[#allocation10 + $0x70] sm:$0xff]  ;;  %v407_v61 = vld [vmem:[#allocation10 + $0x78] sm:$0xff] }
  0x89   :  { %v972_v62 = vpack.c.bf16 %v407_v61, %v406_v60  ;;  %v488_v63 = vld [vmem:[#allocation11] sm:$0xff]  ;;  %v489_v1 = vld [vmem:[#allocation11 + $0x8] sm:$0xff]  ;;  %v490_v2 = vld [vmem:[#allocation11 + $0x10] sm:$0xff] }
  0x8a   :  { %934 = vmatpush3.bf16.msra.mxu0 %v933_v14  ;;  %955 = vmatpush3.bf16.msra.mxu1 %v954_v35  ;;  %v975_v3 = vpack.c.bf16 %v489_v1, %v488_v63  ;;  %v491_v4 = vld [vmem:[#allocation11 + $0x18] sm:$0xff]  ;;  %v492_v6 = vld [vmem:[#allocation11 + $0x20] sm:$0xff]  ;;  %v493_v7 = vld [vmem:[#allocation11 + $0x28] sm:$0xff] }
  0x8b   :  { %935 = vmatprep.subr.bf16.mxu0 %v1232_v10  ;;  %956 = vmatprep.subr.bf16.mxu1 %v1232_v10  ;;  %v978_v5 = vpack.c.bf16 %v491_v4, %v490_v2  ;;  %v981_v8 = vpack.c.bf16 %v493_v7, %v492_v6  ;;  %v494_v9 = vld [vmem:[#allocation11 + $0x30] sm:$0xff]  ;;  %v495_v11 = vld [vmem:[#allocation11 + $0x38] sm:$0xff]  ;;  %v496_v13 = vld [vmem:[#allocation11 + $0x40] sm:$0xff] }
  0x8c   :  { %v984_v12 = vpack.c.bf16 %v495_v11, %v494_v9  ;;  %v497_v14 = vld [vmem:[#allocation11 + $0x48] sm:$0xff]  ;;  %v498_v16 = vld [vmem:[#allocation11 + $0x50] sm:$0xff]  ;;  %v500_v19 = vld [vmem:[#allocation11 + $0x60] sm:$0xff] }
  0x8d   :  { %v987_v15 = vpack.c.bf16 %v497_v14, %v496_v13  ;;  %v700_v22 = vld [vmem:[%s1496_s6] ss:$0 sm:$0xff]  ;;  %v502_v28 = vld [vmem:[#allocation11 + $0x70] sm:$0xff]  ;;  %v584_v31 = vld [vmem:[#allocation13] sm:$0xff] }
  0x8e   :  { %937 = vmatpush3.bf16.msra.mxu0 %v936_v17  ;;  %958 = vmatpush3.bf16.msra.mxu1 %v957_v38  ;;  %v499_v17 = vld [vmem:[#allocation11 + $0x58] sm:$0xff]  ;;  %v585_v32 = vld [vmem:[#allocation13 + $0x8] sm:$0xff]  ;;  %v586_v33 = vld [vmem:[#allocation13 + $0x10] sm:$0xff] }
  0x8f   :  { %938 = vmatprep.subr.bf16.mxu0 %v1232_v10  ;;  %959 = vmatprep.subr.bf16.mxu1 %v1232_v10  ;;  %v990_v18 = vpack.c.bf16 %v499_v17, %v498_v16  ;;  %v999_v34 = vpack.c.bf16 %v585_v32, %v584_v31  ;;  %v587_v35 = vld [vmem:[#allocation13 + $0x18] sm:$0xff]  ;;  %v588_v37 = vld [vmem:[#allocation13 + $0x20] sm:$0xff]  ;;  %v589_v38 = vld [vmem:[#allocation13 + $0x28] sm:$0xff] }
  0x90   :  { %v1002_v36 = vpack.c.bf16 %v587_v35, %v586_v33  ;;  %v1005_v39 = vpack.c.bf16 %v589_v38, %v588_v37  ;;  %v591_v40 = vld [vmem:[#allocation13 + $0x38] sm:$0xff]  ;;  %v592_v42 = vld [vmem:[#allocation13 + $0x40] sm:$0xff]  ;;  %v593_v43 = vld [vmem:[#allocation13 + $0x48] sm:$0xff] }
  0x91   :  { %v594_v45 = vld [vmem:[#allocation13 + $0x50] sm:$0xff]  ;;  %v595_v46 = vld [vmem:[#allocation13 + $0x58] sm:$0xff]  ;;  %v596_v48 = vld [vmem:[#allocation13 + $0x60] sm:$0xff] }
  0x92   :  { %940 = vmatpush3.bf16.msra.mxu0 %v939_v20  ;;  %961 = vmatpush3.bf16.msra.mxu1 %v960_v41  ;;  %v501_v20 = vld [vmem:[#allocation11 + $0x68] sm:$0xff] }
  0x93   :  { %941 = vmatprep.subr.bf16.mxu0 %v1232_v10  ;;  %962 = vmatprep.subr.bf16.mxu1 %v1232_v10  ;;  %v993_v21 = vpack.c.bf16 %v501_v20, %v500_v19  ;;  %v597_v49 = vld [vmem:[#allocation13 + $0x68] sm:$0xff] }
  0x94   :  { %v702_v60 = vld [vmem:[%s1500_s10] ss:$0 sm:$0xff]  ;;  %s1189_s10 = scalar_lea.vmem %s686_s5, 128 }
  0x95   :  { %v703_v2 = vld [vmem:[%s1502_s12] ss:$0 sm:$0xff]  ;;  %p1190_p0 = scmp.ne.s32.totalorder %s686_s5, %s1189_s10  ;;  %p1195_p2 = scmp.lt.s32.totalorder %s1189_s10, %s1189_s10 }
  0x96   :  { %943 = vmatpush3.bf16.msra.mxu0 %v942_v23  ;;  %964 = vmatpush3.bf16.msra.mxu1 %v963_v44  ;;  %v1011_v44 = vpack.c.bf16 %v593_v43, %v592_v42 }
  0x97   :  { %944 = vmatprep.subr.bf16.mxu0 %v1232_v10  ;;  %965 = vmatprep.subr.bf16.mxu1 %v1232_v10  ;;  %p1196_p3 = por %p1195_p2, %p1194_p1 }
  0x99   :  { %p1197_p4 = pnand %p1196_p3, %p1190_p0 }
  0x9a   :  { %946 = vmatpush3.bf16.msra.mxu0 %v945_v26  ;;  %967 = vmatpush3.bf16.msra.mxu1 %v966_v47  ;;  %v1014_v47 = vpack.c.bf16 %v595_v46, %v594_v45 }
  0x9b   :  { %947 = vmatprep.subr.bf16.mxu0 %v1232_v10  ;;  %968 = vmatprep.subr.bf16.mxu1 %v1232_v10 }
  0x9e   :  { %949 = vmatpush3.bf16.msra.mxu0 %v948_v29  ;;  %970 = vmatpush3.bf16.msra.mxu1 %v969_v50  ;;  %v503_v29 = vld [vmem:[#allocation11 + $0x78] sm:$0xff]  ;;  %v1017_v50 = vpack.c.bf16 %v597_v49, %v596_v48 }
  0x9f   :  { %974 = vmatprep.subr.bf16.mxu0 %v1232_v10  ;;  %971 = vmatprep.subr.bf16.mxu1 %v1232_v10  ;;  %v996_v30 = vpack.c.bf16 %v503_v29, %v502_v28 }
  0xa2   :  { %973 = vmatpush3.bf16.msra.mxu1 %v972_v62 }
  0xa3   :  { %998 = vmatprep.subr.bf16.mxu1 %v1232_v10 }
 0x153   :  { %v208_v51 = vpop.f32.mrb[0].mxu0  ;;  %v281_v52 = vpop.f32.mrb[0].mxu1 }
 0x154   :  { %v282_v54 = vadd.f32 %v281_v52, %v208_v51  ;;  %v780_v55 = vpop.f32.mrb[1].mxu0  ;;  %v785_v56 = vpop.f32.mrb[1].mxu1  ;;  %v701_v51 = vld [vmem:[%s1498_s8] ss:$0 sm:$0xff] }
 0x156   :  { %v292_v57 = vadd.f32 %v699_v53, %v282_v54 }
 0x158   :  { %v294_v58 = vmul.f32 0.2, %v292_v57  ;;  %vm293_vm2 = vcmp.gt.f32.partialorder %v292_v57, 0.0 }
 0x15a   :  { %v295_v59 = vsel %vm293_vm2, %v292_v57, %v294_v58  ;;  %v598_v57 = vld [vmem:[#allocation13 + $0x70] sm:$0xff]  ;;  %v599_v58 = vld [vmem:[#allocation13 + $0x78] sm:$0xff] }
 0x15b   :  { %819 = vmatmul.mubr.f32.vlgmr.msra.gmra.mrb[2].mxu0 %v295_v59  ;;  %v1020_v59 = vpack.c.bf16 %v599_v58, %v598_v57 }
 0x15c   :  { %888 = vmatprep.mubr.msk.f32.mxu0 %vm1231_vm0, %v1230_v0  ;;  %976 = vmatpush3.bf16.msra.mxu0 %v975_v3 }
 0x15d   :  { %977 = vmatprep.subr.bf16.mxu0 %v1232_v10 }
 0x160   :  { %979 = vmatpush3.bf16.msra.mxu0 %v978_v5 }
 0x161   :  { %980 = vmatprep.subr.bf16.mxu0 %v1232_v10 }
 0x164   :  { %982 = vmatpush3.bf16.msra.mxu0 %v981_v8 }
 0x165   :  { %983 = vmatprep.subr.bf16.mxu0 %v1232_v10 }
 0x168   :  { %985 = vmatpush3.bf16.msra.mxu0 %v984_v12 }
 0x169   :  { %986 = vmatprep.subr.bf16.mxu0 %v1232_v10 }
 0x16c   :  { %988 = vmatpush3.bf16.msra.mxu0 %v987_v15 }
 0x16d   :  { %989 = vmatprep.subr.bf16.mxu0 %v1232_v10 }
 0x170   :  { %991 = vmatpush3.bf16.msra.mxu0 %v990_v18 }
 0x171   :  { %992 = vmatprep.subr.bf16.mxu0 %v1232_v10 }
 0x174   :  { %994 = vmatpush3.bf16.msra.mxu0 %v993_v21 }
 0x175   :  { %995 = vmatprep.subr.bf16.mxu0 %v1232_v10 }
 0x178   :  { %997 = vmatpush3.bf16.msra.mxu0 %v996_v30 }
 0x22e   :  { %v385_v23 = vpop.f32.mrb[2].mxu0 }
 0x22f   :  { %v386_v24 = vadd.f32 %v700_v22, %v385_v23  ;;  %v820_v25 = vpop.f32.mrb[3].mxu0 }
 0x231   :  { %vm389_vm3 = vcmp.gt.f32.partialorder %v386_v24, 0.0  ;;  %v390_v26 = vmul.f32 0.2, %v386_v24 }
 0x233   :  { %v391_v27 = vsel %vm389_vm3, %v386_v24, %v390_v26 }
 0x234   :  { %854 = vmatmul.mubr.f32.vlgmr.msra.gmra.mrb[2].mxu1 %v391_v27 }
 0x235   :  { %923 = vmatprep.mubr.msk.f32.mxu1 %vm1231_vm0, %v1230_v0  ;;  %1000 = vmatpush3.bf16.msra.mxu1 %v999_v34  ;;  %v590_v0 = vld [vmem:[#allocation13 + $0x30] sm:$0xff] }
 0x236   :  { %1001 = vmatprep.subr.bf16.mxu1 %v1232_v10  ;;  %v1008_v41 = vpack.c.bf16 %v591_v40, %v590_v0 }
 0x239   :  { %1003 = vmatpush3.bf16.msra.mxu1 %v1002_v36 }
 0x23a   :  { %1004 = vmatprep.subr.bf16.mxu1 %v1232_v10 }
 0x23d   :  { %1006 = vmatpush3.bf16.msra.mxu1 %v1005_v39 }
 0x23e   :  { %1007 = vmatprep.subr.bf16.mxu1 %v1232_v10 }
 0x241   :  { %1009 = vmatpush3.bf16.msra.mxu1 %v1008_v41 }
 0x242   :  { %1010 = vmatprep.subr.bf16.mxu1 %v1232_v10 }
 0x245   :  { %1012 = vmatpush3.bf16.msra.mxu1 %v1011_v44 }
 0x246   :  { %1013 = vmatprep.subr.bf16.mxu1 %v1232_v10 }
 0x249   :  { %1015 = vmatpush3.bf16.msra.mxu1 %v1014_v47 }
 0x24a   :  { %1016 = vmatprep.subr.bf16.mxu1 %v1232_v10 }
 0x24d   :  { %1018 = vmatpush3.bf16.msra.mxu1 %v1017_v50 }
 0x24e   :  { %1019 = vmatprep.subr.bf16.mxu1 %v1232_v10 }
 0x251   :  { %1021 = vmatpush3.bf16.msra.mxu1 %v1020_v59 }
 0x307   :  { %v481_v52 = vpop.f32.mrb[2].mxu1 }
 0x308   :  { %v482_v53 = vadd.f32 %v701_v51, %v481_v52  ;;  %v855_v54 = vpop.f32.mrb[3].mxu1 }
 0x30a   :  { %vm485_vm4 = vcmp.gt.f32.partialorder %v482_v53, 0.0  ;;  %v486_v55 = vmul.f32 0.2, %v482_v53 }
 0x30c   :  { %v487_v56 = vsel %vm485_vm4, %v482_v53, %v486_v55 }
 0x30d   :  { %889 = vmatmul.mubr.f32.vlgmr.msra.gmra.mrb[4].mxu0 %v487_v56 }
 0x3e0   :  { %v577_v10 = vpop.f32.mrb[4].mxu0 }
 0x3e1   :  { %v578_v61 = vadd.f32 %v702_v60, %v577_v10  ;;  %v890_v62 = vpop.f32.mrb[5].mxu0 }
 0x3e3   :  { %vm581_vm5 = vcmp.gt.f32.partialorder %v578_v61, 0.0  ;;  %v582_v63 = vmul.f32 0.2, %v578_v61 }
 0x3e5   :  { %v583_v1 = vsel %vm581_vm5, %v578_v61, %v582_v63 }
 0x3e6   :  { %924 = vmatmul.mubr.f32.vlgmr.msra.gmra.mrb[4].mxu1 %v583_v1 }
 0x4b9   :  { %v673_v3 = vpop.f32.mrb[4].mxu1 }
 0x4ba   :  { %v674_v4 = vadd.f32 %v703_v2, %v673_v3  ;;  %v925_v5 = vpop.f32.mrb[5].mxu1 }
 0x4bc   :  { %v677_v6 = vmax.f32 %v674_v4, 0.0 }
 0x4be   :  { %678 = vst [vmem:[#allocation14] sm:$0xff] %v677_v6 }
 0x4bf   :  { %1200 = shalt.err (!%p1197_p4)
}
 0x4c0   :  { %s1201_s28 = scalar_lea.hbm %s1503_s13, 128 }
 0x4c1   :  { %p1202_p5 = scmp.ne.s32.totalorder %s1503_s13, %s1201_s28  ;;  %p1205_p6 = scmp.lt.u32.totalorder %s1201_s28, %s1503_s13 }
 0x4c3   :  { %p1207_p7 = pnand %p1205_p6, %p1202_p5 }
 0x4c5   :  { %1210 = shalt.err (!%p1207_p7)
}
 0x4c6   :  { %688 = dma.vmem_to_hbm [thread:$0]  %s686_s5, 128, %s1503_s13, [#allocation4]  }
 0x4c7   :  { %1219 = dma.done.wait [#allocation4], 128  }
 0x4c8   :  { %1220 = vsyncadd [#allocation4], 4294967168 }
 0x4c9   :  { %692 = vsyncpa [#allocation3], 1 }
 0x4ca   :  { %693 = vsyncpa [#allocation6], 1 }
 0x4cb   :  { %694 = vsyncpa [#allocation9], 1 }
 0x4cc   :  { %695 = vsyncpa [#allocation12], 1 }
 0x4cd   :  { %696 = vsyncpa [#allocation4], 1 }

// kernel: tpu_custom_call.1
= control target key start
LH: loop header
LB: loop body
LE: loop exit
PB: predicated region body
PF: predicated region fallthrough
CT: control target
= control target key end

     0   :  { %18 = vsyncpa [#allocation3], 0  ;;  %s1490_s0 = inlined_call_operand.hbm [shape: f32[8,8], index: 0, kind: input, shape index: {}]   ;;  %s1491_s1 = inlined_call_operand.hbm [shape: f32[8,8], index: 1, kind: input, shape index: {}]   ;;  %s1492_s2 = inlined_call_operand.hbm [shape: f32[8,128], index: 2, kind: input, shape index: {}]   ;;  %s1493_s3 = inlined_call_operand.vmem [shape: f32[8,128], index: 3, kind: input, shape index: {}]   ;;  %s1494_s4 = inlined_call_operand.vmem [shape: f32[1,128], index: 4, kind: input, shape index: {}]   ;;  %s1495_s5 = inlined_call_operand.hbm [shape: f32[128,128], index: 5, kind: input, shape index: {}]   ;;  %s1496_s6 = inlined_call_operand.vmem [shape: f32[1,128], index: 6, kind: input, shape index: {}]   ;;  %s1497_s7 = inlined_call_operand.hbm [shape: f32[128,128], index: 7, kind: input, shape index: {}]   ;;  %s1498_s8 = inlined_call_operand.vmem [shape: f32[1,128], index: 8, kind: input, shape index: {}]   ;;  %s1499_s9 = inlined_call_operand.hbm [shape: f32[128,128], index: 9, kind: input, shape index: {}]   ;;  %s1500_s10 = inlined_call_operand.vmem [shape: f32[1,128], index: 10, kind: input, shape index: {}]   ;;  %s1501_s11 = inlined_call_operand.hbm [shape: f32[128,128], index: 11, kind: input, shape index: {}]   ;;  %s1502_s12 = inlined_call_operand.vmem [shape: f32[1,128], index: 12, kind: input, shape index: {}]   ;;  %s1503_s13 = inlined_call_operand.hbm [shape: f32[8,128], index: 13, kind: output, shape index: {}]  }
   0x1   :  { %19 = vsyncpa [#allocation6], 0 }
   0x2   :  { %20 = vsyncpa [#allocation9], 0 }
   0x3   :  { %21 = vsyncpa [#allocation12], 0 }
   0x4   :  { %22 = vsyncpa [#allocation4], 0  ;;  %s1221_s25 = smov [#allocation5]   ;;  %s1222_s27 = smov [#allocation8]  }
   0x5   :  { %s39_s26 = sshll.u32 %s1221_s25, 4  ;;  %s62_s28 = sshll.u32 %s1222_s27, 4  ;;  %s40_s26 = int_to_ptr.vmem [resolvable:$true] %s39_s26  ;;  %s1304_s28 = int_to_ptr.vmem [resolvable:$true] %s62_s28 }
   0x6   :  { %s1035_s14 = scalar_lea.hbm %s1491_s1, 128 }
   0x7   :  { %p1036_p0 = scmp.ne.s32.totalorder %s1491_s1, %s1035_s14  ;;  %p1039_p1 = scmp.lt.u32.totalorder %s1035_s14, %s1491_s1 }
   0x9   :  { %p1041_p2 = pnand %p1039_p1, %p1036_p0 }
   0xb   :  { %1044 = shalt.err (!%p1041_p2)
}
   0xc   :  { %s1045_s19 = scalar_lea.vmem %s40_s26, 128  ;;  %p1050_p4 = scmp.lt.s32.totalorder %s40_s26, %s40_s26 }
   0xd   :  { %p1046_p3 = scmp.ne.s32.totalorder %s40_s26, %s1045_s19  ;;  %p1051_p5 = scmp.lt.s32.totalorder %s1045_s19, %s1045_s19 }
   0xf   :  { %p1052_p6 = por %p1051_p5, %p1050_p4 }
  0x11   :  { %p1053_p7 = pnand %p1052_p6, %p1046_p3 }
  0x13   :  { %1056 = shalt.err (!%p1053_p7)
}
  0x14   :  { %42 = dma.hbm_to_vmem [thread:$0]  %s1491_s1, 128, %s40_s26, [#allocation6]  }
  0x15   :  { %s1057_s24 = scalar_lea.hbm %s1495_s5, 2048 }
  0x16   :  { %p1058_p8 = scmp.ne.s32.totalorder %s1495_s5, %s1057_s24  ;;  %p1061_p9 = scmp.lt.u32.totalorder %s1057_s24, %s1495_s5 }
  0x18   :  { %p1063_p10 = pnand %p1061_p9, %p1058_p8 }
  0x1a   :  { %1066 = shalt.err (!%p1063_p10)
}
  0x1b   :  { %s1067_s14 = scalar_lea.vmem %s1304_s28, 2048  ;;  %p1072_p12 = scmp.lt.s32.totalorder %s1304_s28, %s1304_s28 }
  0x1c   :  { %p1068_p11 = scmp.ne.s32.totalorder %s1304_s28, %s1067_s14  ;;  %p1073_p13 = scmp.lt.s32.totalorder %s1067_s14, %s1067_s14 }
  0x1e   :  { %p1074_p0 = por %p1073_p13, %p1072_p12 }
  0x20   :  { %p1075_p1 = pnand %p1074_p0, %p1068_p11 }
  0x22   :  { %1078 = shalt.err (!%p1075_p1)
}
  0x23   :  { %s1223_s1 = smov 128   ;;  %s1224_s26 = smov 8  }
  0x24   :  { %68 = dma.hbm_to_vmem [thread:$0]  %s1495_s5, 2048, %s1304_s28, [#allocation9], %s1223_s1, %s1223_s1, %s1224_s26  }
  0x25   :  { %s1225_s17 = smov [#allocation11]   ;;  %s1226_s19 = smov [#allocation2]  }
  0x26   :  { %s90_s18 = sshll.u32 %s1225_s17, 4  ;;  %s29_s20 = sshll.u32 %s1226_s19, 4  ;;  %s91_s18 = int_to_ptr.vmem [resolvable:$true] %s90_s18  ;;  %s30_s20 = int_to_ptr.vmem [resolvable:$true] %s29_s20 }
  0x27   :  { %s1079_s23 = scalar_lea.hbm %s1499_s9, 2048 }
  0x28   :  { %p1080_p2 = scmp.ne.s32.totalorder %s1499_s9, %s1079_s23  ;;  %p1083_p3 = scmp.lt.u32.totalorder %s1079_s23, %s1499_s9 }
  0x2a   :  { %p1085_p4 = pnand %p1083_p3, %p1080_p2 }
  0x2c   :  { %1088 = shalt.err (!%p1085_p4)
}
  0x2d   :  { %s1089_s5 = scalar_lea.vmem %s91_s18, 2048  ;;  %p1094_p6 = scmp.lt.s32.totalorder %s91_s18, %s91_s18 }
  0x2e   :  { %p1090_p5 = scmp.ne.s32.totalorder %s91_s18, %s1089_s5  ;;  %p1095_p7 = scmp.lt.s32.totalorder %s1089_s5, %s1089_s5 }
  0x30   :  { %p1096_p8 = por %p1095_p7, %p1094_p6 }
  0x32   :  { %p1097_p9 = pnand %p1096_p8, %p1090_p5 }
  0x34   :  { %1100 = shalt.err (!%p1097_p9)
}
  0x35   :  { %96 = dma.hbm_to_vmem [thread:$0]  %s1499_s9, 2048, %s91_s18, [#allocation12], %s1223_s1, %s1223_s1, %s1224_s26  }
  0x36   :  { %s1101_s16 = scalar_lea.hbm %s1490_s0, 128 }
  0x37   :  { %p1102_p10 = scmp.ne.s32.totalorder %s1490_s0, %s1101_s16  ;;  %p1105_p11 = scmp.lt.u32.totalorder %s1101_s16, %s1490_s0 }
  0x39   :  { %p1107_p12 = pnand %p1105_p11, %p1102_p10 }
  0x3b   :  { %1110 = shalt.err (!%p1107_p12)
}
  0x3c   :  { %s1111_s23 = scalar_lea.vmem %s30_s20, 128  ;;  %p1116_p0 = scmp.lt.s32.totalorder %s30_s20, %s30_s20 }
  0x3d   :  { %p1112_p13 = scmp.ne.s32.totalorder %s30_s20, %s1111_s23  ;;  %p1117_p1 = scmp.lt.s32.totalorder %s1111_s23, %s1111_s23 }
  0x3f   :  { %p1118_p2 = por %p1117_p1, %p1116_p0 }
  0x41   :  { %p1119_p3 = pnand %p1118_p2, %p1112_p13 }
  0x43   :  { %1122 = shalt.err (!%p1119_p3)
}
  0x44   :  { %32 = dma.hbm_to_vmem [thread:$0]  %s1490_s0, 128, %s30_s20, [#allocation3]  }
  0x45   :  { %s1227_s24 = smov [#allocation7]   ;;  %s1228_s27 = smov [#allocation10]  }
  0x46   :  { %s49_s25 = sshll.u32 %s1227_s24, 4  ;;  %s76_s29 = sshll.u32 %s1228_s27, 4  ;;  %s50_s25 = int_to_ptr.vmem [resolvable:$true] %s49_s25  ;;  %s1365_s29 = int_to_ptr.vmem [resolvable:$true] %s76_s29 }
  0x47   :  { %s1123_s30 = scalar_lea.hbm %s1492_s2, 128 }
  0x48   :  { %p1124_p4 = scmp.ne.s32.totalorder %s1492_s2, %s1123_s30  ;;  %p1127_p5 = scmp.lt.u32.totalorder %s1123_s30, %s1492_s2 }
  0x4a   :  { %p1129_p6 = pnand %p1127_p5, %p1124_p4 }
  0x4c   :  { %1132 = shalt.err (!%p1129_p6)
}
  0x4d   :  { %s1133_s0 = scalar_lea.vmem %s50_s25, 128  ;;  %p1138_p8 = scmp.lt.s32.totalorder %s50_s25, %s50_s25 }
  0x4e   :  { %p1134_p7 = scmp.ne.s32.totalorder %s50_s25, %s1133_s0  ;;  %p1139_p9 = scmp.lt.s32.totalorder %s1133_s0, %s1133_s0 }
  0x50   :  { %p1140_p10 = por %p1139_p9, %p1138_p8 }
  0x52   :  { %p1141_p11 = pnand %p1140_p10, %p1134_p7 }
  0x54   :  { %1144 = shalt.err (!%p1141_p11)
}
  0x55   :  { %52 = dma.hbm_to_vmem [thread:$0]  %s1492_s2, 128, %s50_s25, [#allocation6]  }
  0x56   :  { %s1145_s23 = scalar_lea.hbm %s1497_s7, 2048 }
  0x57   :  { %p1146_p12 = scmp.ne.s32.totalorder %s1497_s7, %s1145_s23  ;;  %p1149_p13 = scmp.lt.u32.totalorder %s1145_s23, %s1497_s7 }
  0x59   :  { %p1151_p0 = pnand %p1149_p13, %p1146_p12 }
  0x5b   :  { %1154 = shalt.err (!%p1151_p0)
}
  0x5c   :  { %s1155_s5 = scalar_lea.vmem %s1365_s29, 2048  ;;  %p1160_p2 = scmp.lt.s32.totalorder %s1365_s29, %s1365_s29 }
  0x5d   :  { %p1156_p1 = scmp.ne.s32.totalorder %s1365_s29, %s1155_s5  ;;  %p1161_p3 = scmp.lt.s32.totalorder %s1155_s5, %s1155_s5 }
  0x5f   :  { %p1162_p4 = por %p1161_p3, %p1160_p2 }
  0x61   :  { %p1163_p5 = pnand %p1162_p4, %p1156_p1 }
  0x63   :  { %1166 = shalt.err (!%p1163_p5)
}
  0x64   :  { %82 = dma.hbm_to_vmem [thread:$0]  %s1497_s7, 2048, %s1365_s29, [#allocation9], %s1223_s1, %s1223_s1, %s1224_s26  }
  0x65   :  { %s1229_s28 = smov [#allocation13]   ;;  %s1167_s16 = scalar_lea.hbm %s1501_s11, 2048 }
  0x66   :  { %s104_s30 = sshll.u32 %s1229_s28, 4  ;;  %p1168_p6 = scmp.ne.s32.totalorder %s1501_s11, %s1167_s16  ;;  %s105_s30 = int_to_ptr.vmem [resolvable:$true] %s104_s30 }
  0x67   :  { %p1171_p7 = scmp.lt.u32.totalorder %s1167_s16, %s1501_s11 }
  0x69   :  { %p1173_p8 = pnand %p1171_p7, %p1168_p6 }
  0x6b   :  { %1176 = shalt.err (!%p1173_p8)
}
  0x6c   :  { %s1177_s21 = scalar_lea.vmem %s105_s30, 2048  ;;  %p1182_p10 = scmp.lt.s32.totalorder %s105_s30, %s105_s30 }
  0x6d   :  { %p1178_p9 = scmp.ne.s32.totalorder %s105_s30, %s1177_s21  ;;  %p1183_p11 = scmp.lt.s32.totalorder %s1177_s21, %s1177_s21 }
  0x6f   :  { %p1184_p12 = por %p1183_p11, %p1182_p10 }
  0x71   :  { %p1185_p13 = pnand %p1184_p12, %p1178_p9 }
  0x73   :  { %1188 = shalt.err (!%p1185_p13)
}
  0x74   :  { %110 = dma.hbm_to_vmem [thread:$0]  %s1501_s11, 2048, %s105_s30, [#allocation12], %s1223_s1, %s1223_s1, %s1224_s26  }
  0x75   :  { %1211 = dma.done.wait [#allocation3], 128  }
  0x76   :  { %1212 = vsyncadd [#allocation3], 4294967168 }
  0x77   :  { %1213 = dma.done.wait [#allocation6], 256  }
  0x78   :  { %1214 = vsyncadd [#allocation6], 4294967040 }
  0x79   :  { %1215 = dma.done.wait [#allocation9], 4096  }
  0x7a   :  { %1216 = vsyncadd [#allocation9], 4294963200 }
  0x7b   :  { %1217 = dma.done.wait [#allocation12], 4096  }
  0x7c   :  { %1218 = vsyncadd [#allocation12], 4294963200  ;;  %v1230_v0 = vmov 0.0   ;;  %vm1231_vm0 = vmmov 0   ;;  %vm138_vm1 = vcmask 64512   ;;  %v137_v1 = vld [vmem:[%s1493_s3] sm:$0xff] }
  0x7d   :  { %776 = vmatprep.subr.mxu0 %v1230_v0  ;;  %781 = vmatprep.subr.mxu1 %v1230_v0  ;;  %v135_v2 = vld [vmem:[#allocation7] sm:$0xff]  ;;  %v136_v3 = vld [vmem:[#allocation5] sm:$0xff]  ;;  %v134_v4 = vld [vmem:[#allocation2] sm:$0xff]  ;;  %v1232_v10 = vmov 0.0|0.0   ;;  %s1233_s27 = smov [#allocation14]  }
  0x7e   :  { %778 = vmatprep.mubr.msk.f32.mxu0 %vm1231_vm0, %v1230_v0  ;;  %783 = vmatprep.mubr.msk.f32.mxu1 %vm1231_vm0, %v1230_v0  ;;  %v296_v5 = vld [vmem:[#allocation8] sm:$0xff]  ;;  %v297_v6 = vld [vmem:[#allocation8 + $0x8] sm:$0xff]  ;;  %v298_v8 = vld [vmem:[#allocation8 + $0x10] sm:$0xff]  ;;  %s685_s5 = sshll.u32 %s1233_s27, 4  ;;  %s686_s5 = int_to_ptr.vmem [resolvable:$true] %s685_s5 }
  0x7f   :  { %777 = vmatpush3.msra.mxu0 %v137_v1  ;;  %782 = vmatpush3.msra.mxu1 %v135_v2  ;;  %v927_v7 = vpack.c.bf16 %v297_v6, %v296_v5  ;;  %v299_v9 = vld [vmem:[#allocation8 + $0x18] sm:$0xff]  ;;  %v300_v12 = vld [vmem:[#allocation8 + $0x20] sm:$0xff]  ;;  %v301_v13 = vld [vmem:[#allocation8 + $0x28] sm:$0xff]  ;;  %p1194_p1 = scmp.lt.s32.totalorder %s686_s5, %s686_s5 }
  0x80   :  { %779 = vmatmul.mubr.msk.f32.vlgmr.msra.gmra.mrb[0].mxu0 %vm138_vm1, %v136_v3  ;;  %784 = vmatmul.mubr.msk.f32.vlgmr.msra.gmra.mrb[0].mxu1 %vm138_vm1, %v134_v4  ;;  %v930_v11 = vpack.c.bf16 %v299_v9, %v298_v8  ;;  %v933_v14 = vpack.c.bf16 %v301_v13, %v300_v12  ;;  %v302_v15 = vld [vmem:[#allocation8 + $0x30] sm:$0xff]  ;;  %v303_v16 = vld [vmem:[#allocation8 + $0x38] sm:$0xff]  ;;  %v304_v18 = vld [vmem:[#allocation8 + $0x40] sm:$0xff] }
  0x81   :  { %926 = vmatprep.subr.bf16.mxu0 %v1232_v10  ;;  %818 = vmatprep.mubr.msk.f32.mxu0 %vm1231_vm0, %v1230_v0  ;;  %v936_v17 = vpack.c.bf16 %v303_v16, %v302_v15  ;;  %v305_v19 = vld [vmem:[#allocation8 + $0x48] sm:$0xff]  ;;  %v306_v21 = vld [vmem:[#allocation8 + $0x50] sm:$0xff]  ;;  %v307_v22 = vld [vmem:[#allocation8 + $0x58] sm:$0xff] }
  0x82   :  { %928 = vmatpush3.bf16.msra.mxu0 %v927_v7  ;;  %950 = vmatprep.subr.bf16.mxu1 %v1232_v10  ;;  %v939_v20 = vpack.c.bf16 %v305_v19, %v304_v18  ;;  %v942_v23 = vpack.c.bf16 %v307_v22, %v306_v21  ;;  %v308_v24 = vld [vmem:[#allocation8 + $0x60] sm:$0xff]  ;;  %v309_v25 = vld [vmem:[#allocation8 + $0x68] sm:$0xff]  ;;  %v310_v27 = vld [vmem:[#allocation8 + $0x70] sm:$0xff] }
  0x83   :  { %929 = vmatprep.subr.bf16.mxu0 %v1232_v10  ;;  %853 = vmatprep.mubr.msk.f32.mxu1 %vm1231_vm0, %v1230_v0  ;;  %v945_v26 = vpack.c.bf16 %v309_v25, %v308_v24  ;;  %v311_v28 = vld [vmem:[#allocation8 + $0x78] sm:$0xff]  ;;  %v392_v30 = vld [vmem:[#allocation10] sm:$0xff]  ;;  %v393_v31 = vld [vmem:[#allocation10 + $0x8] sm:$0xff] }
  0x84   :  { %v948_v29 = vpack.c.bf16 %v311_v28, %v310_v27  ;;  %v394_v32 = vld [vmem:[#allocation10 + $0x10] sm:$0xff]  ;;  %v951_v33 = vpack.c.bf16 %v393_v31, %v392_v30  ;;  %v395_v34 = vld [vmem:[#allocation10 + $0x18] sm:$0xff]  ;;  %v396_v36 = vld [vmem:[#allocation10 + $0x20] sm:$0xff] }
  0x85   :  { %v954_v35 = vpack.c.bf16 %v395_v34, %v394_v32  ;;  %v397_v37 = vld [vmem:[#allocation10 + $0x28] sm:$0xff]  ;;  %v398_v39 = vld [vmem:[#allocation10 + $0x30] sm:$0xff]  ;;  %v399_v40 = vld [vmem:[#allocation10 + $0x38] sm:$0xff] }
  0x86   :  { %931 = vmatpush3.bf16.msra.mxu0 %v930_v11  ;;  %952 = vmatpush3.bf16.msra.mxu1 %v951_v33  ;;  %v957_v38 = vpack.c.bf16 %v397_v37, %v396_v36  ;;  %v960_v41 = vpack.c.bf16 %v399_v40, %v398_v39  ;;  %v400_v42 = vld [vmem:[#allocation10 + $0x40] sm:$0xff]  ;;  %v401_v43 = vld [vmem:[#allocation10 + $0x48] sm:$0xff]  ;;  %v402_v45 = vld [vmem:[#allocation10 + $0x50] sm:$0xff] }
  0x87   :  { %932 = vmatprep.subr.bf16.mxu0 %v1232_v10  ;;  %953 = vmatprep.subr.bf16.mxu1 %v1232_v10  ;;  %v963_v44 = vpack.c.bf16 %v401_v43, %v400_v42  ;;  %v403_v46 = vld [vmem:[#allocation10 + $0x58] sm:$0xff]  ;;  %v404_v48 = vld [vmem:[#allocation10 + $0x60] sm:$0xff]  ;;  %v405_v49 = vld [vmem:[#allocation10 + $0x68] sm:$0xff] }
  0x88   :  { %v966_v47 = vpack.c.bf16 %v403_v46, %v402_v45  ;;  %v969_v50 = vpack.c.bf16 %v405_v49, %v404_v48  ;;  %v699_v53 = vld [vmem:[%s1494_s4] ss:$0 sm:$0xff]  ;;  %v406_v60 = vld [vmem:[#allocation10 + $0x70] sm:$0xff]  ;;  %v407_v61 = vld [vmem:[#allocation10 + $0x78] sm:$0xff] }
  0x89   :  { %v972_v62 = vpack.c.bf16 %v407_v61, %v406_v60  ;;  %v488_v63 = vld [vmem:[#allocation11] sm:$0xff]  ;;  %v489_v1 = vld [vmem:[#allocation11 + $0x8] sm:$0xff]  ;;  %v490_v2 = vld [vmem:[#allocation11 + $0x10] sm:$0xff] }
  0x8a   :  { %934 = vmatpush3.bf16.msra.mxu0 %v933_v14  ;;  %955 = vmatpush3.bf16.msra.mxu1 %v954_v35  ;;  %v975_v3 = vpack.c.bf16 %v489_v1, %v488_v63  ;;  %v491_v4 = vld [vmem:[#allocation11 + $0x18] sm:$0xff]  ;;  %v492_v6 = vld [vmem:[#allocation11 + $0x20] sm:$0xff]  ;;  %v493_v7 = vld [vmem:[#allocation11 + $0x28] sm:$0xff] }
  0x8b   :  { %935 = vmatprep.subr.bf16.mxu0 %v1232_v10  ;;  %956 = vmatprep.subr.bf16.mxu1 %v1232_v10  ;;  %v978_v5 = vpack.c.bf16 %v491_v4, %v490_v2  ;;  %v981_v8 = vpack.c.bf16 %v493_v7, %v492_v6  ;;  %v494_v9 = vld [vmem:[#allocation11 + $0x30] sm:$0xff]  ;;  %v495_v11 = vld [vmem:[#allocation11 + $0x38] sm:$0xff]  ;;  %v496_v13 = vld [vmem:[#allocation11 + $0x40] sm:$0xff] }
  0x8c   :  { %v984_v12 = vpack.c.bf16 %v495_v11, %v494_v9  ;;  %v497_v14 = vld [vmem:[#allocation11 + $0x48] sm:$0xff]  ;;  %v498_v16 = vld [vmem:[#allocation11 + $0x50] sm:$0xff]  ;;  %v500_v19 = vld [vmem:[#allocation11 + $0x60] sm:$0xff] }
  0x8d   :  { %v987_v15 = vpack.c.bf16 %v497_v14, %v496_v13  ;;  %v700_v22 = vld [vmem:[%s1496_s6] ss:$0 sm:$0xff]  ;;  %v502_v28 = vld [vmem:[#allocation11 + $0x70] sm:$0xff]  ;;  %v584_v31 = vld [vmem:[#allocation13] sm:$0xff] }
  0x8e   :  { %937 = vmatpush3.bf16.msra.mxu0 %v936_v17  ;;  %958 = vmatpush3.bf16.msra.mxu1 %v957_v38  ;;  %v499_v17 = vld [vmem:[#allocation11 + $0x58] sm:$0xff]  ;;  %v585_v32 = vld [vmem:[#allocation13 + $0x8] sm:$0xff]  ;;  %v586_v33 = vld [vmem:[#allocation13 + $0x10] sm:$0xff] }
  0x8f   :  { %938 = vmatprep.subr.bf16.mxu0 %v1232_v10  ;;  %959 = vmatprep.subr.bf16.mxu1 %v1232_v10  ;;  %v990_v18 = vpack.c.bf16 %v499_v17, %v498_v16  ;;  %v999_v34 = vpack.c.bf16 %v585_v32, %v584_v31  ;;  %v587_v35 = vld [vmem:[#allocation13 + $0x18] sm:$0xff]  ;;  %v588_v37 = vld [vmem:[#allocation13 + $0x20] sm:$0xff]  ;;  %v589_v38 = vld [vmem:[#allocation13 + $0x28] sm:$0xff] }
  0x90   :  { %v1002_v36 = vpack.c.bf16 %v587_v35, %v586_v33  ;;  %v1005_v39 = vpack.c.bf16 %v589_v38, %v588_v37  ;;  %v591_v40 = vld [vmem:[#allocation13 + $0x38] sm:$0xff]  ;;  %v592_v42 = vld [vmem:[#allocation13 + $0x40] sm:$0xff]  ;;  %v593_v43 = vld [vmem:[#allocation13 + $0x48] sm:$0xff] }
  0x91   :  { %v594_v45 = vld [vmem:[#allocation13 + $0x50] sm:$0xff]  ;;  %v595_v46 = vld [vmem:[#allocation13 + $0x58] sm:$0xff]  ;;  %v596_v48 = vld [vmem:[#allocation13 + $0x60] sm:$0xff] }
  0x92   :  { %940 = vmatpush3.bf16.msra.mxu0 %v939_v20  ;;  %961 = vmatpush3.bf16.msra.mxu1 %v960_v41  ;;  %v501_v20 = vld [vmem:[#allocation11 + $0x68] sm:$0xff] }
  0x93   :  { %941 = vmatprep.subr.bf16.mxu0 %v1232_v10  ;;  %962 = vmatprep.subr.bf16.mxu1 %v1232_v10  ;;  %v993_v21 = vpack.c.bf16 %v501_v20, %v500_v19  ;;  %v597_v49 = vld [vmem:[#allocation13 + $0x68] sm:$0xff] }
  0x94   :  { %v702_v60 = vld [vmem:[%s1500_s10] ss:$0 sm:$0xff]  ;;  %s1189_s10 = scalar_lea.vmem %s686_s5, 128 }
  0x95   :  { %v703_v2 = vld [vmem:[%s1502_s12] ss:$0 sm:$0xff]  ;;  %p1190_p0 = scmp.ne.s32.totalorder %s686_s5, %s1189_s10  ;;  %p1195_p2 = scmp.lt.s32.totalorder %s1189_s10, %s1189_s10 }
  0x96   :  { %943 = vmatpush3.bf16.msra.mxu0 %v942_v23  ;;  %964 = vmatpush3.bf16.msra.mxu1 %v963_v44  ;;  %v1011_v44 = vpack.c.bf16 %v593_v43, %v592_v42 }
  0x97   :  { %944 = vmatprep.subr.bf16.mxu0 %v1232_v10  ;;  %965 = vmatprep.subr.bf16.mxu1 %v1232_v10  ;;  %p1196_p3 = por %p1195_p2, %p1194_p1 }
  0x99   :  { %p1197_p4 = pnand %p1196_p3, %p1190_p0 }
  0x9a   :  { %946 = vmatpush3.bf16.msra.mxu0 %v945_v26  ;;  %967 = vmatpush3.bf16.msra.mxu1 %v966_v47  ;;  %v1014_v47 = vpack.c.bf16 %v595_v46, %v594_v45 }
  0x9b   :  { %947 = vmatprep.subr.bf16.mxu0 %v1232_v10  ;;  %968 = vmatprep.subr.bf16.mxu1 %v1232_v10 }
  0x9e   :  { %949 = vmatpush3.bf16.msra.mxu0 %v948_v29  ;;  %970 = vmatpush3.bf16.msra.mxu1 %v969_v50  ;;  %v503_v29 = vld [vmem:[#allocation11 + $0x78] sm:$0xff]  ;;  %v1017_v50 = vpack.c.bf16 %v597_v49, %v596_v48 }
  0x9f   :  { %974 = vmatprep.subr.bf16.mxu0 %v1232_v10  ;;  %971 = vmatprep.subr.bf16.mxu1 %v1232_v10  ;;  %v996_v30 = vpack.c.bf16 %v503_v29, %v502_v28 }
  0xa2   :  { %973 = vmatpush3.bf16.msra.mxu1 %v972_v62 }
  0xa3   :  { %998 = vmatprep.subr.bf16.mxu1 %v1232_v10 }
 0x153   :  { %v208_v51 = vpop.f32.mrb[0].mxu0  ;;  %v281_v52 = vpop.f32.mrb[0].mxu1 }
 0x154   :  { %v282_v54 = vadd.f32 %v281_v52, %v208_v51  ;;  %v780_v55 = vpop.f32.mrb[1].mxu0  ;;  %v785_v56 = vpop.f32.mrb[1].mxu1  ;;  %v701_v51 = vld [vmem:[%s1498_s8] ss:$0 sm:$0xff] }
 0x156   :  { %v292_v57 = vadd.f32 %v699_v53, %v282_v54 }
 0x158   :  { %v294_v58 = vmul.f32 0.2, %v292_v57  ;;  %vm293_vm2 = vcmp.gt.f32.partialorder %v292_v57, 0.0 }
 0x15a   :  { %v295_v59 = vsel %vm293_vm2, %v292_v57, %v294_v58  ;;  %v598_v57 = vld [vmem:[#allocation13 + $0x70] sm:$0xff]  ;;  %v599_v58 = vld [vmem:[#allocation13 + $0x78] sm:$0xff] }
 0x15b   :  { %819 = vmatmul.mubr.f32.vlgmr.msra.gmra.mrb[2].mxu0 %v295_v59  ;;  %v1020_v59 = vpack.c.bf16 %v599_v58, %v598_v57 }
 0x15c   :  { %888 = vmatprep.mubr.msk.f32.mxu0 %vm1231_vm0, %v1230_v0  ;;  %976 = vmatpush3.bf16.msra.mxu0 %v975_v3 }
 0x15d   :  { %977 = vmatprep.subr.bf16.mxu0 %v1232_v10 }
 0x160   :  { %979 = vmatpush3.bf16.msra.mxu0 %v978_v5 }
 0x161   :  { %980 = vmatprep.subr.bf16.mxu0 %v1232_v10 }
 0x164   :  { %982 = vmatpush3.bf16.msra.mxu0 %v981_v8 }
 0x165   :  { %983 = vmatprep.subr.bf16.mxu0 %v1232_v10 }
 0x168   :  { %985 = vmatpush3.bf16.msra.mxu0 %v984_v12 }
 0x169   :  { %986 = vmatprep.subr.bf16.mxu0 %v1232_v10 }
 0x16c   :  { %988 = vmatpush3.bf16.msra.mxu0 %v987_v15 }
 0x16d   :  { %989 = vmatprep.subr.bf16.mxu0 %v1232_v10 }
 0x170   :  { %991 = vmatpush3.bf16.msra.mxu0 %v990_v18 }
 0x171   :  { %992 = vmatprep.subr.bf16.mxu0 %v1232_v10 }
 0x174   :  { %994 = vmatpush3.bf16.msra.mxu0 %v993_v21 }
 0x175   :  { %995 = vmatprep.subr.bf16.mxu0 %v1232_v10 }
 0x178   :  { %997 = vmatpush3.bf16.msra.mxu0 %v996_v30 }
 0x22e   :  { %v385_v23 = vpop.f32.mrb[2].mxu0 }
 0x22f   :  { %v386_v24 = vadd.f32 %v700_v22, %v385_v23  ;;  %v820_v25 = vpop.f32.mrb[3].mxu0 }
 0x231   :  { %vm389_vm3 = vcmp.gt.f32.partialorder %v386_v24, 0.0  ;;  %v390_v26 = vmul.f32 0.2, %v386_v24 }
 0x233   :  { %v391_v27 = vsel %vm389_vm3, %v386_v24, %v390_v26 }
 0x234   :  { %854 = vmatmul.mubr.f32.vlgmr.msra.gmra.mrb[2].mxu1 %v391_v27 }
 0x235   :  { %923 = vmatprep.mubr.msk.f32.mxu1 %vm1231_vm0, %v1230_v0  ;;  %1000 = vmatpush3.bf16.msra.mxu1 %v999_v34  ;;  %v590_v0 = vld [vmem:[#allocation13 + $0x30] sm:$0xff] }
 0x236   :  { %1001 = vmatprep.subr.bf16.mxu1 %v1232_v10  ;;  %v1008_v41 = vpack.c.bf16 %v591_v40, %v590_v0 }
 0x239   :  { %1003 = vmatpush3.bf16.msra.mxu1 %v1002_v36 }
 0x23a   :  { %1004 = vmatprep.subr.bf16.mxu1 %v1232_v10 }
 0x23d   :  { %1006 = vmatpush3.bf16.msra.mxu1 %v1005_v39 }
 0x23e   :  { %1007 = vmatprep.subr.bf16.mxu1 %v1232_v10 }
 0x241   :  { %1009 = vmatpush3.bf16.msra.mxu1 %v1008_v41 }
 0x242   :  { %1010 = vmatprep.subr.bf16.mxu1 %v1232_v10 }
 0x245   :  { %1012 = vmatpush3.bf16.msra.mxu1 %v1011_v44 }
 0x246   :  { %1013 = vmatprep.subr.bf16.mxu1 %v1232_v10 }
 0x249   :  { %1015 = vmatpush3.bf16.msra.mxu1 %v1014_v47 }
 0x24a   :  { %1016 = vmatprep.subr.bf16.mxu1 %v1232_v10 }
 0x24d   :  { %1018 = vmatpush3.bf16.msra.mxu1 %v1017_v50 }
 0x24e   :  { %1019 = vmatprep.subr.bf16.mxu1 %v1232_v10 }
 0x251   :  { %1021 = vmatpush3.bf16.msra.mxu1 %v1020_v59 }
 0x307   :  { %v481_v52 = vpop.f32.mrb[2].mxu1 }
 0x308   :  { %v482_v53 = vadd.f32 %v701_v51, %v481_v52  ;;  %v855_v54 = vpop.f32.mrb[3].mxu1 }
 0x30a   :  { %vm485_vm4 = vcmp.gt.f32.partialorder %v482_v53, 0.0  ;;  %v486_v55 = vmul.f32 0.2, %v482_v53 }
 0x30c   :  { %v487_v56 = vsel %vm485_vm4, %v482_v53, %v486_v55 }
 0x30d   :  { %889 = vmatmul.mubr.f32.vlgmr.msra.gmra.mrb[4].mxu0 %v487_v56 }
 0x3e0   :  { %v577_v10 = vpop.f32.mrb[4].mxu0 }
 0x3e1   :  { %v578_v61 = vadd.f32 %v702_v60, %v577_v10  ;;  %v890_v62 = vpop.f32.mrb[5].mxu0 }
 0x3e3   :  { %vm581_vm5 = vcmp.gt.f32.partialorder %v578_v61, 0.0  ;;  %v582_v63 = vmul.f32 0.2, %v578_v61 }
 0x3e5   :  { %v583_v1 = vsel %vm581_vm5, %v578_v61, %v582_v63 }
 0x3e6   :  { %924 = vmatmul.mubr.f32.vlgmr.msra.gmra.mrb[4].mxu1 %v583_v1 }
 0x4b9   :  { %v673_v3 = vpop.f32.mrb[4].mxu1 }
 0x4ba   :  { %v674_v4 = vadd.f32 %v703_v2, %v673_v3  ;;  %v925_v5 = vpop.f32.mrb[5].mxu1 }
 0x4bc   :  { %v677_v6 = vmax.f32 %v674_v4, 0.0 }
 0x4be   :  { %678 = vst [vmem:[#allocation14] sm:$0xff] %v677_v6 }
 0x4bf   :  { %1200 = shalt.err (!%p1197_p4)
}
 0x4c0   :  { %s1201_s28 = scalar_lea.hbm %s1503_s13, 128 }
 0x4c1   :  { %p1202_p5 = scmp.ne.s32.totalorder %s1503_s13, %s1201_s28  ;;  %p1205_p6 = scmp.lt.u32.totalorder %s1201_s28, %s1503_s13 }
 0x4c3   :  { %p1207_p7 = pnand %p1205_p6, %p1202_p5 }
 0x4c5   :  { %1210 = shalt.err (!%p1207_p7)
}
 0x4c6   :  { %688 = dma.vmem_to_hbm [thread:$0]  %s686_s5, 128, %s1503_s13, [#allocation4]  }
 0x4c7   :  { %1219 = dma.done.wait [#allocation4], 128  }
 0x4c8   :  { %1220 = vsyncadd [#allocation4], 4294967168 }
 0x4c9   :  { %692 = vsyncpa [#allocation3], 1 }
 0x4ca   :  { %693 = vsyncpa [#allocation6], 1 }
 0x4cb   :  { %694 = vsyncpa [#allocation9], 1 }
 0x4cc   :  { %695 = vsyncpa [#allocation12], 1 }
 0x4cd   :  { %696 = vsyncpa [#allocation4], 1 }

</bundles_post_ra>
